<compile_context>
chip_gen: v7x
topology: tpu7x:2x2x1
jax: 0.10.0
libtpu: 0.0.40
codegen_flags: <defaults>
</compile_context>

<pallas_src>
import functools

import jax
import jax.numpy as jnp
from jax.experimental import pallas as pl
from jax.experimental.pallas import tpu as pltpu


def _round_up(x, m):
    return ((x + m - 1) // m) * m


# ----------------------------------------------------------------------------
# Pallas kernels
# ----------------------------------------------------------------------------
def _matmul_bias_kernel(x_ref, w_ref, b_ref, o_ref, *, relu):
    # x: (TM, Kp), w: (Kp, Np), b: (1, Np) -> o: (TM, Np)
    acc = jnp.dot(x_ref[...], w_ref[...], preferred_element_type=jnp.float32)
    acc = acc + b_ref[...]
    if relu:
        acc = jnp.maximum(acc, 0.0)
    o_ref[...] = acc.astype(o_ref.dtype)


def _max4_kernel(a_ref, b_ref, c_ref, d_ref, o_ref):
    o_ref[...] = jnp.maximum(
        jnp.maximum(a_ref[...], b_ref[...]),
        jnp.maximum(c_ref[...], d_ref[...]),
    )


def _fused_fc_kernel(x_ref, w1_ref, b1_ref, w2_ref, b2_ref, w3_ref, b3_ref,
                     o_ref):
    # fc1 -> relu -> fc2 -> relu -> fc3, all intermediates stay on-chip.
    h1 = jnp.dot(x_ref[...], w1_ref[...], preferred_element_type=jnp.float32)
    h1 = jnp.maximum(h1 + b1_ref[...], 0.0)
    h2 = jnp.dot(h1, w2_ref[...], preferred_element_type=jnp.float32)
    h2 = jnp.maximum(h2 + b2_ref[...], 0.0)
    out = jnp.dot(h2, w3_ref[...], preferred_element_type=jnp.float32)
    o_ref[...] = (out + b3_ref[...]).astype(o_ref.dtype)


# ----------------------------------------------------------------------------
# Pallas wrappers
# ----------------------------------------------------------------------------
def matmul_bias_relu(x, w, b, *, relu, tile_m=256):
    """y = relu(x @ w + b). K and N are zero-padded to multiples of 128, M is
    tiled with a real grid. Returns the PADDED (Mp, Np) result (caller slices).
    """
    M, K = x.shape
    K2, Nout = w.shape
    assert K == K2
    Kp = _round_up(K, 128)
    Np = _round_up(Nout, 128)
    tile = tile_m if M >= tile_m else _round_up(M, 8)
    Mp = _round_up(M, tile)

    xp = jnp.pad(x, ((0, Mp - M), (0, Kp - K)))
    wp = jnp.pad(w, ((0, Kp - K), (0, Np - Nout)))
    bp = jnp.pad(b, (0, Np - Nout)).reshape(1, Np)

    return pl.pallas_call(
        functools.partial(_matmul_bias_kernel, relu=relu),
        out_shape=jax.ShapeDtypeStruct((Mp, Np), jnp.float32),
        grid=(Mp // tile,),
        in_specs=[
            pl.BlockSpec((tile, Kp), lambda i: (i, 0)),
            pl.BlockSpec((Kp, Np), lambda i: (0, 0)),
            pl.BlockSpec((1, Np), lambda i: (0, 0)),
        ],
        out_specs=pl.BlockSpec((tile, Np), lambda i: (i, 0)),
        compiler_params=pltpu.CompilerParams(
            dimension_semantics=("parallel",)),
        cost_estimate=pl.CostEstimate(
            flops=2 * Mp * Kp * Np,
            transcendentals=0,
            bytes_accessed=4 * (Mp * Kp + Kp * Np + Mp * Np),
        ),
    )(xp, wp, bp)


def maxpool2x2_nhwc(x):
    """2x2 / stride-2 max pool on NHWC input whose C is already 128-padded.
    The elementwise max runs in a Pallas kernel over a lane-dense (M, 128)
    layout; the four strided window views are cheap XLA slicing glue."""
    N, H, W, C = x.shape
    Ho, Wo = H // 2, W // 2
    M = N * Ho * Wo
    a = x[:, 0::2, 0::2, :].reshape(M, C)
    b = x[:, 0::2, 1::2, :].reshape(M, C)
    c = x[:, 1::2, 0::2, :].reshape(M, C)
    d = x[:, 1::2, 1::2, :].reshape(M, C)

    tile = 512 if M >= 512 else _round_up(M, 8)
    Mp = _round_up(M, tile)
    pad = lambda t: jnp.pad(t, ((0, Mp - M), (0, 0)))
    spec = pl.BlockSpec((tile, C), lambda i: (i, 0))

    out = pl.pallas_call(
        _max4_kernel,
        out_shape=jax.ShapeDtypeStruct((Mp, C), jnp.float32),
        grid=(Mp // tile,),
        in_specs=[spec, spec, spec, spec],
        out_specs=spec,
        compiler_params=pltpu.CompilerParams(
            dimension_semantics=("parallel",)),
    )(pad(a), pad(b), pad(c), pad(d))
    return out[:M].reshape(N, Ho, Wo, C)


def fused_fc(x, w1, b1, w2, b2, w3, b3):
    """fc1(relu) -> fc2(relu) -> fc3 in a single pallas_call.
    All hidden/output widths are padded to 128 (padded rows/cols are zero, so
    the math is unchanged); returns the valid (M, 10) logits."""
    M, K = x.shape
    Mp = _round_up(M, 8)
    H1, H2, NO = 128, 128, 128  # padded 120 / 84 / 10

    xp = jnp.pad(x, ((0, Mp - M), (0, 0)))
    w1p = jnp.pad(w1, ((0, 0), (0, H1 - w1.shape[1])))
    b1p = jnp.pad(b1, (0, H1 - b1.shape[0])).reshape(1, H1)
    w2p = jnp.pad(w2, ((0, H1 - w2.shape[0]), (0, H2 - w2.shape[1])))
    b2p = jnp.pad(b2, (0, H2 - b2.shape[0])).reshape(1, H2)
    w3p = jnp.pad(w3, ((0, H2 - w3.shape[0]), (0, NO - w3.shape[1])))
    b3p = jnp.pad(b3, (0, NO - b3.shape[0])).reshape(1, NO)

    out = pl.pallas_call(
        _fused_fc_kernel,
        out_shape=jax.ShapeDtypeStruct((Mp, NO), jnp.float32),
        grid=(1,),
        in_specs=[
            pl.BlockSpec((Mp, K), lambda i: (0, 0)),
            pl.BlockSpec((K, H1), lambda i: (0, 0)),
            pl.BlockSpec((1, H1), lambda i: (0, 0)),
            pl.BlockSpec((H1, H2), lambda i: (0, 0)),
            pl.BlockSpec((1, H2), lambda i: (0, 0)),
            pl.BlockSpec((H2, NO), lambda i: (0, 0)),
            pl.BlockSpec((1, NO), lambda i: (0, 0)),
        ],
        out_specs=pl.BlockSpec((Mp, NO), lambda i: (0, 0)),
        compiler_params=pltpu.CompilerParams(
            dimension_semantics=("arbitrary",)),
        cost_estimate=pl.CostEstimate(
            flops=2 * Mp * (K * H1 + H1 * H2 + H2 * NO),
            transcendentals=0,
            bytes_accessed=4 * (Mp * K + K * H1 + H1 * H2 + H2 * NO + Mp * NO),
        ),
    )(xp, w1p, b1p, w2p, b2p, w3p, b3p)
    return out[:M, :10]


# ----------------------------------------------------------------------------
# Plain-JAX glue: im2col over NHWC (slicing/stack only; matmul is in Pallas)
# ----------------------------------------------------------------------------
def conv2d_relu_nhwc(x, w, b):
    """x: (N, H, W, Cin) NHWC; w: (Cout, Cin, k, k) (PyTorch layout); b: (Cout,)
    Returns (N, Ho, Wo, 128) with valid output in the first Cout channels
    (extra channels are zero, which is harmless through relu/pool)."""
    Cout, Cin, k, _ = w.shape
    N, H, W, Cin2 = x.shape
    assert Cin == Cin2
    Ho, Wo = H - k + 1, W - k + 1
    cols = []
    for i in range(k):
        for j in range(k):
            cols.append(x[:, i:i + Ho, j:j + Wo, :])
    patches = jnp.stack(cols, axis=3)                 # (N, Ho, Wo, k*k, Cin)
    patches = patches.reshape(N * Ho * Wo, k * k * Cin)
    # weight rows ordered (kh, kw, cin) to match the patches ordering
    w_mat = w.transpose(2, 3, 1, 0).reshape(k * k * Cin, Cout)
    y = matmul_bias_relu(patches, w_mat, b, relu=True)  # (Mp, 128)
    return y[:N * Ho * Wo].reshape(N, Ho, Wo, -1)


# ----------------------------------------------------------------------------
# LeNet forward
# ----------------------------------------------------------------------------
def init_params(key):
    ks = jax.random.split(key, 10)

    def uni(k, shape, fan_in):
        bound = 1.0 / jnp.sqrt(fan_in)
        return jax.random.uniform(k, shape, jnp.float32, -bound, bound)

    p = {}
    p["conv1_w"] = uni(ks[0], (16, 3, 5, 5), 3 * 5 * 5)
    p["conv1_b"] = uni(ks[1], (16,), 3 * 5 * 5)
    p["conv2_w"] = uni(ks[2], (32, 16, 5, 5), 16 * 5 * 5)
    p["conv2_b"] = uni(ks[3], (32,), 16 * 5 * 5)
    p["fc1_w"] = uni(ks[4], (32 * 5 * 5, 120), 32 * 5 * 5)   # rows: (c, h, w)
    p["fc1_b"] = uni(ks[5], (120,), 32 * 5 * 5)
    p["fc2_w"] = uni(ks[6], (120, 84), 120)
    p["fc2_b"] = uni(ks[7], (84,), 120)
    p["fc3_w"] = uni(ks[8], (84, 10), 84)
    p["fc3_b"] = uni(ks[9], (10,), 84)
    return p


@jax.jit
def lenet_forward(params, x):
    # x: (N, 3, 32, 32) float32 (NCHW like PyTorch). One NHWC conversion at the
    # model boundary; activations stay NHWC (channels-last, 128-padded) after.
    N = x.shape[0]
    xh = jnp.transpose(x, (0, 2, 3, 1))                              # (N,32,32,3)
    out = conv2d_relu_nhwc(xh, params["conv1_w"], params["conv1_b"]) # (N,28,28,128)
    out = maxpool2x2_nhwc(out)                                       # (N,14,14,128)
    out = out[..., :16]                                              # real channels
    out = conv2d_relu_nhwc(out, params["conv2_w"], params["conv2_b"])# (N,10,10,128)
    out = maxpool2x2_nhwc(out)                                       # (N,5,5,128)
    out = out[..., :32]                                              # (N,5,5,32)
    flat = out.reshape(N, 5 * 5 * 32)                                # (h,w,c) order
    # Permute fc1 weight input dim from PyTorch's (c,h,w) flatten order to
    # the NHWC (h,w,c) flatten order so the math matches the reference.
    w1 = (params["fc1_w"].reshape(32, 5, 5, 120)
          .transpose(1, 2, 0, 3).reshape(800, 120))
    logits = fused_fc(flat, w1, params["fc1_b"],
                      params["fc2_w"], params["fc2_b"],
                      params["fc3_w"], params["fc3_b"])              # (N,10)
    return logits


if __name__ == "__main__":
    key = jax.random.PRNGKey(0)
    k_param, k_x = jax.random.split(key)
    params = init_params(k_param)
    # LeNet's 32*5*5 flatten implies 32x32 spatial input with 3 channels.
    x = jax.random.normal(k_x, (2, 3, 32, 32), jnp.float32)
    y = lenet_forward(params, x)
    jax.block_until_ready(y)
    assert y.shape == (2, 10) and y.dtype == jnp.float32
    print("KERNEL_OK")
</pallas_src>

<mosaic_0001>
module attributes {stable_mosaic.version = 11 : i64} {
  func.func @_matmul_bias_kernel(%arg0: i32, %arg1: memref<256x128xf32, #tpu.memory_space<vmem>>, %arg2: memref<128x128xf32, #tpu.memory_space<vmem>>, %arg3: memref<1x128xf32, #tpu.memory_space<vmem>>, %arg4: memref<256x128xf32, #tpu.memory_space<vmem>>) attributes {dimension_semantics = [#tpu.dimension_semantics<parallel>], iteration_bounds = array<i64: 7>, scalar_prefetch = 0 : i64, scratch_operands = 0 : i64, tpu.core_type = #tpu.core_type<tc>, window_params = [{transform_indices = @transform_0, window_bounds = array<i64: 256, 128>}, {pipeline_mode = #tpu.pipeline_mode<synchronous>, transform_indices = @transform_1, window_bounds = array<i64: 128, 128>}, {pipeline_mode = #tpu.pipeline_mode<synchronous>, transform_indices = @transform_2, window_bounds = array<i64: 1, 128>}, {transform_indices = @transform_3, window_bounds = array<i64: 256, 128>}]} {
    %c0 = arith.constant 0 : index
    %c0_0 = arith.constant 0 : index
    %0 = vector.load %arg1[%c0, %c0_0] : memref<256x128xf32, #tpu.memory_space<vmem>>, vector<256x128xf32>
    %c0_1 = arith.constant 0 : index
    %c0_2 = arith.constant 0 : index
    %1 = vector.load %arg2[%c0_1, %c0_2] : memref<128x128xf32, #tpu.memory_space<vmem>>, vector<128x128xf32>
    %cst = arith.constant dense<0.000000e+00> : vector<256x128xf32>
    %2 = tpu.matmul %0, %1, %cst {dimension_numbers = #tpu.dot_dimension_numbers<[1], [0], [0], [1], [0, 0, 1, 1], [], []>} : vector<256x128xf32>, vector<128x128xf32>, vector<256x128xf32> -> vector<256x128xf32>
    %c0_3 = arith.constant 0 : index
    %c0_4 = arith.constant 0 : index
    %3 = vector.load %arg3[%c0_3, %c0_4] : memref<1x128xf32, #tpu.memory_space<vmem>>, vector<1x128xf32>
    %4 = vector.broadcast %3 : vector<1x128xf32> to vector<256x128xf32>
    %5 = arith.addf %2, %4 : vector<256x128xf32>
    %cst_5 = arith.constant 0.000000e+00 : f32
    %6 = vector.broadcast %cst_5 : f32 to vector<256x128xf32>
    %7 = arith.maximumf %5, %6 : vector<256x128xf32>
    %c0_6 = arith.constant 0 : index
    %c0_7 = arith.constant 0 : index
    %8 = vector.load %arg4[%c0_6, %c0_7] : memref<256x128xf32, #tpu.memory_space<vmem>>, vector<256x128xf32>
    tpu.vector_store %arg4[%c0_6, %c0_7], %7 {strides = array<i32>} : memref<256x128xf32, #tpu.memory_space<vmem>>, vector<256x128xf32>,
    return
  }
  func.func @transform_0(%arg0: i32) -> (i32, i32) {
    %c0_i32 = arith.constant 0 : i32
    %c0_i32_0 = arith.constant 0 : i32
    return %arg0, %c0_i32 : i32, i32
  }
  func.func @transform_1(%arg0: i32) -> (i32, i32) {
    %c0_i32 = arith.constant 0 : i32
    %c0_i32_0 = arith.constant 0 : i32
    %c0_i32_1 = arith.constant 0 : i32
    return %c0_i32, %c0_i32_0 : i32, i32
  }
  func.func @transform_2(%arg0: i32) -> (i32, i32) {
    %c0_i32 = arith.constant 0 : i32
    %c0_i32_0 = arith.constant 0 : i32
    %c0_i32_1 = arith.constant 0 : i32
    return %c0_i32, %c0_i32_0 : i32, i32
  }
  func.func @transform_3(%arg0: i32) -> (i32, i32) {
    %c0_i32 = arith.constant 0 : i32
    %c0_i32_0 = arith.constant 0 : i32
    return %arg0, %c0_i32 : i32, i32
  }
}

module attributes {stable_mosaic.version = 11 : i64} {
  func.func @_max4_kernel(%arg0: i32, %arg1: memref<392x128xf32, #tpu.memory_space<vmem>>, %arg2: memref<392x128xf32, #tpu.memory_space<vmem>>, %arg3: memref<392x128xf32, #tpu.memory_space<vmem>>, %arg4: memref<392x128xf32, #tpu.memory_space<vmem>>, %arg5: memref<392x128xf32, #tpu.memory_space<vmem>>) attributes {dimension_semantics = [#tpu.dimension_semantics<parallel>], iteration_bounds = array<i64: 1>, scalar_prefetch = 0 : i64, scratch_operands = 0 : i64, tpu.core_type = #tpu.core_type<tc>, window_params = [{transform_indices = @transform_0, window_bounds = array<i64: 392, 128>}, {transform_indices = @transform_1, window_bounds = array<i64: 392, 128>}, {transform_indices = @transform_2, window_bounds = array<i64: 392, 128>}, {transform_indices = @transform_3, window_bounds = array<i64: 392, 128>}, {transform_indices = @transform_4, window_bounds = array<i64: 392, 128>}]} {
    %c0 = arith.constant 0 : index
    %c0_0 = arith.constant 0 : index
    %0 = vector.load %arg1[%c0, %c0_0] : memref<392x128xf32, #tpu.memory_space<vmem>>, vector<392x128xf32>
    %c0_1 = arith.constant 0 : index
    %c0_2 = arith.constant 0 : index
    %1 = vector.load %arg2[%c0_1, %c0_2] : memref<392x128xf32, #tpu.memory_space<vmem>>, vector<392x128xf32>
    %2 = arith.maximumf %0, %1 : vector<392x128xf32>
    %c0_3 = arith.constant 0 : index
    %c0_4 = arith.constant 0 : index
    %3 = vector.load %arg3[%c0_3, %c0_4] : memref<392x128xf32, #tpu.memory_space<vmem>>, vector<392x128xf32>
    %c0_5 = arith.constant 0 : index
    %c0_6 = arith.constant 0 : index
    %4 = vector.load %arg4[%c0_5, %c0_6] : memref<392x128xf32, #tpu.memory_space<vmem>>, vector<392x128xf32>
    %5 = arith.maximumf %3, %4 : vector<392x128xf32>
    %6 = arith.maximumf %2, %5 : vector<392x128xf32>
    %c0_7 = arith.constant 0 : index
    %c0_8 = arith.constant 0 : index
    %7 = vector.load %arg5[%c0_7, %c0_8] : memref<392x128xf32, #tpu.memory_space<vmem>>, vector<392x128xf32>
    tpu.vector_store %arg5[%c0_7, %c0_8], %6 {strides = array<i32>} : memref<392x128xf32, #tpu.memory_space<vmem>>, vector<392x128xf32>,
    return
  }
  func.func @transform_0(%arg0: i32) -> (i32, i32) {
    %c0_i32 = arith.constant 0 : i32
    %c0_i32_0 = arith.constant 0 : i32
    return %arg0, %c0_i32 : i32, i32
  }
  func.func @transform_1(%arg0: i32) -> (i32, i32) {
    %c0_i32 = arith.constant 0 : i32
    %c0_i32_0 = arith.constant 0 : i32
    return %arg0, %c0_i32 : i32, i32
  }
  func.func @transform_2(%arg0: i32) -> (i32, i32) {
    %c0_i32 = arith.constant 0 : i32
    %c0_i32_0 = arith.constant 0 : i32
    return %arg0, %c0_i32 : i32, i32
  }
  func.func @transform_3(%arg0: i32) -> (i32, i32) {
    %c0_i32 = arith.constant 0 : i32
    %c0_i32_0 = arith.constant 0 : i32
    return %arg0, %c0_i32 : i32, i32
  }
  func.func @transform_4(%arg0: i32) -> (i32, i32) {
    %c0_i32 = arith.constant 0 : i32
    %c0_i32_0 = arith.constant 0 : i32
    return %arg0, %c0_i32 : i32, i32
  }
}

module attributes {stable_mosaic.version = 11 : i64} {
  func.func @_matmul_bias_kernel(%arg0: i32, %arg1: memref<200x512xf32, #tpu.memory_space<vmem>>, %arg2: memref<512x128xf32, #tpu.memory_space<vmem>>, %arg3: memref<1x128xf32, #tpu.memory_space<vmem>>, %arg4: memref<200x128xf32, #tpu.memory_space<vmem>>) attributes {dimension_semantics = [#tpu.dimension_semantics<parallel>], iteration_bounds = array<i64: 1>, scalar_prefetch = 0 : i64, scratch_operands = 0 : i64, tpu.core_type = #tpu.core_type<tc>, window_params = [{transform_indices = @transform_0, window_bounds = array<i64: 200, 512>}, {pipeline_mode = #tpu.pipeline_mode<synchronous>, transform_indices = @transform_1, window_bounds = array<i64: 512, 128>}, {pipeline_mode = #tpu.pipeline_mode<synchronous>, transform_indices = @transform_2, window_bounds = array<i64: 1, 128>}, {transform_indices = @transform_3, window_bounds = array<i64: 200, 128>}]} {
    %c0 = arith.constant 0 : index
    %c0_0 = arith.constant 0 : index
    %0 = vector.load %arg1[%c0, %c0_0] : memref<200x512xf32, #tpu.memory_space<vmem>>, vector<200x512xf32>
    %c0_1 = arith.constant 0 : index
    %c0_2 = arith.constant 0 : index
    %1 = vector.load %arg2[%c0_1, %c0_2] : memref<512x128xf32, #tpu.memory_space<vmem>>, vector<512x128xf32>
    %cst = arith.constant dense<0.000000e+00> : vector<200x128xf32>
    %2 = tpu.matmul %0, %1, %cst {dimension_numbers = #tpu.dot_dimension_numbers<[1], [0], [0], [1], [0, 0, 1, 1], [], []>} : vector<200x512xf32>, vector<512x128xf32>, vector<200x128xf32> -> vector<200x128xf32>
    %c0_3 = arith.constant 0 : index
    %c0_4 = arith.constant 0 : index
    %3 = vector.load %arg3[%c0_3, %c0_4] : memref<1x128xf32, #tpu.memory_space<vmem>>, vector<1x128xf32>
    %4 = vector.broadcast %3 : vector<1x128xf32> to vector<200x128xf32>
    %5 = arith.addf %2, %4 : vector<200x128xf32>
    %cst_5 = arith.constant 0.000000e+00 : f32
    %6 = vector.broadcast %cst_5 : f32 to vector<200x128xf32>
    %7 = arith.maximumf %5, %6 : vector<200x128xf32>
    %c0_6 = arith.constant 0 : index
    %c0_7 = arith.constant 0 : index
    %8 = vector.load %arg4[%c0_6, %c0_7] : memref<200x128xf32, #tpu.memory_space<vmem>>, vector<200x128xf32>
    tpu.vector_store %arg4[%c0_6, %c0_7], %7 {strides = array<i32>} : memref<200x128xf32, #tpu.memory_space<vmem>>, vector<200x128xf32>,
    return
  }
  func.func @transform_0(%arg0: i32) -> (i32, i32) {
    %c0_i32 = arith.constant 0 : i32
    %c0_i32_0 = arith.constant 0 : i32
    return %arg0, %c0_i32 : i32, i32
  }
  func.func @transform_1(%arg0: i32) -> (i32, i32) {
    %c0_i32 = arith.constant 0 : i32
    %c0_i32_0 = arith.constant 0 : i32
    %c0_i32_1 = arith.constant 0 : i32
    return %c0_i32, %c0_i32_0 : i32, i32
  }
  func.func @transform_2(%arg0: i32) -> (i32, i32) {
    %c0_i32 = arith.constant 0 : i32
    %c0_i32_0 = arith.constant 0 : i32
    %c0_i32_1 = arith.constant 0 : i32
    return %c0_i32, %c0_i32_0 : i32, i32
  }
  func.func @transform_3(%arg0: i32) -> (i32, i32) {
    %c0_i32 = arith.constant 0 : i32
    %c0_i32_0 = arith.constant 0 : i32
    return %arg0, %c0_i32 : i32, i32
  }
}

module attributes {stable_mosaic.version = 11 : i64} {
  func.func @_max4_kernel(%arg0: i32, %arg1: memref<56x128xf32, #tpu.memory_space<vmem>>, %arg2: memref<56x128xf32, #tpu.memory_space<vmem>>, %arg3: memref<56x128xf32, #tpu.memory_space<vmem>>, %arg4: memref<56x128xf32, #tpu.memory_space<vmem>>, %arg5: memref<56x128xf32, #tpu.memory_space<vmem>>) attributes {dimension_semantics = [#tpu.dimension_semantics<parallel>], iteration_bounds = array<i64: 1>, scalar_prefetch = 0 : i64, scratch_operands = 0 : i64, tpu.core_type = #tpu.core_type<tc>, window_params = [{transform_indices = @transform_0, window_bounds = array<i64: 56, 128>}, {transform_indices = @transform_1, window_bounds = array<i64: 56, 128>}, {transform_indices = @transform_2, window_bounds = array<i64: 56, 128>}, {transform_indices = @transform_3, window_bounds = array<i64: 56, 128>}, {transform_indices = @transform_4, window_bounds = array<i64: 56, 128>}]} {
    %c0 = arith.constant 0 : index
    %c0_0 = arith.constant 0 : index
    %0 = vector.load %arg1[%c0, %c0_0] : memref<56x128xf32, #tpu.memory_space<vmem>>, vector<56x128xf32>
    %c0_1 = arith.constant 0 : index
    %c0_2 = arith.constant 0 : index
    %1 = vector.load %arg2[%c0_1, %c0_2] : memref<56x128xf32, #tpu.memory_space<vmem>>, vector<56x128xf32>
    %2 = arith.maximumf %0, %1 : vector<56x128xf32>
    %c0_3 = arith.constant 0 : index
    %c0_4 = arith.constant 0 : index
    %3 = vector.load %arg3[%c0_3, %c0_4] : memref<56x128xf32, #tpu.memory_space<vmem>>, vector<56x128xf32>
    %c0_5 = arith.constant 0 : index
    %c0_6 = arith.constant 0 : index
    %4 = vector.load %arg4[%c0_5, %c0_6] : memref<56x128xf32, #tpu.memory_space<vmem>>, vector<56x128xf32>
    %5 = arith.maximumf %3, %4 : vector<56x128xf32>
    %6 = arith.maximumf %2, %5 : vector<56x128xf32>
    %c0_7 = arith.constant 0 : index
    %c0_8 = arith.constant 0 : index
    %7 = vector.load %arg5[%c0_7, %c0_8] : memref<56x128xf32, #tpu.memory_space<vmem>>, vector<56x128xf32>
    tpu.vector_store %arg5[%c0_7, %c0_8], %6 {strides = array<i32>} : memref<56x128xf32, #tpu.memory_space<vmem>>, vector<56x128xf32>,
    return
  }
  func.func @transform_0(%arg0: i32) -> (i32, i32) {
    %c0_i32 = arith.constant 0 : i32
    %c0_i32_0 = arith.constant 0 : i32
    return %arg0, %c0_i32 : i32, i32
  }
  func.func @transform_1(%arg0: i32) -> (i32, i32) {
    %c0_i32 = arith.constant 0 : i32
    %c0_i32_0 = arith.constant 0 : i32
    return %arg0, %c0_i32 : i32, i32
  }
  func.func @transform_2(%arg0: i32) -> (i32, i32) {
    %c0_i32 = arith.constant 0 : i32
    %c0_i32_0 = arith.constant 0 : i32
    return %arg0, %c0_i32 : i32, i32
  }
  func.func @transform_3(%arg0: i32) -> (i32, i32) {
    %c0_i32 = arith.constant 0 : i32
    %c0_i32_0 = arith.constant 0 : i32
    return %arg0, %c0_i32 : i32, i32
  }
  func.func @transform_4(%arg0: i32) -> (i32, i32) {
    %c0_i32 = arith.constant 0 : i32
    %c0_i32_0 = arith.constant 0 : i32
    return %arg0, %c0_i32 : i32, i32
  }
}

module attributes {stable_mosaic.version = 11 : i64} {
  func.func @_fused_fc_kernel(%arg0: i32, %arg1: memref<8x800xf32, #tpu.memory_space<vmem>>, %arg2: memref<800x128xf32, #tpu.memory_space<vmem>>, %arg3: memref<1x128xf32, #tpu.memory_space<vmem>>, %arg4: memref<128x128xf32, #tpu.memory_space<vmem>>, %arg5: memref<1x128xf32, #tpu.memory_space<vmem>>, %arg6: memref<128x128xf32, #tpu.memory_space<vmem>>, %arg7: memref<1x128xf32, #tpu.memory_space<vmem>>, %arg8: memref<8x128xf32, #tpu.memory_space<vmem>>) attributes {dimension_semantics = [#tpu.dimension_semantics<arbitrary>], iteration_bounds = array<i64: 1>, scalar_prefetch = 0 : i64, scratch_operands = 0 : i64, tpu.core_type = #tpu.core_type<tc>, window_params = [{pipeline_mode = #tpu.pipeline_mode<synchronous>, transform_indices = @transform_0, window_bounds = array<i64: 8, 800>}, {pipeline_mode = #tpu.pipeline_mode<synchronous>, transform_indices = @transform_1, window_bounds = array<i64: 800, 128>}, {pipeline_mode = #tpu.pipeline_mode<synchronous>, transform_indices = @transform_2, window_bounds = array<i64: 1, 128>}, {pipeline_mode = #tpu.pipeline_mode<synchronous>, transform_indices = @transform_3, window_bounds = array<i64: 128, 128>}, {pipeline_mode = #tpu.pipeline_mode<synchronous>, transform_indices = @transform_4, window_bounds = array<i64: 1, 128>}, {pipeline_mode = #tpu.pipeline_mode<synchronous>, transform_indices = @transform_5, window_bounds = array<i64: 128, 128>}, {pipeline_mode = #tpu.pipeline_mode<synchronous>, transform_indices = @transform_6, window_bounds = array<i64: 1, 128>}, {pipeline_mode = #tpu.pipeline_mode<synchronous>, transform_indices = @transform_7, window_bounds = array<i64: 8, 128>}]} {
    %c0 = arith.constant 0 : index
    %c0_0 = arith.constant 0 : index
    %0 = vector.load %arg1[%c0, %c0_0] : memref<8x800xf32, #tpu.memory_space<vmem>>, vector<8x800xf32>
    %c0_1 = arith.constant 0 : index
    %c0_2 = arith.constant 0 : index
    %1 = vector.load %arg2[%c0_1, %c0_2] : memref<800x128xf32, #tpu.memory_space<vmem>>, vector<800x128xf32>
    %cst = arith.constant dense<0.000000e+00> : vector<8x128xf32>
    %2 = tpu.matmul %0, %1, %cst {dimension_numbers = #tpu.dot_dimension_numbers<[1], [0], [0], [1], [0, 0, 1, 1], [], []>} : vector<8x800xf32>, vector<800x128xf32>, vector<8x128xf32> -> vector<8x128xf32>
    %c0_3 = arith.constant 0 : index
    %c0_4 = arith.constant 0 : index
    %3 = vector.load %arg3[%c0_3, %c0_4] : memref<1x128xf32, #tpu.memory_space<vmem>>, vector<1x128xf32>
    %4 = vector.broadcast %3 : vector<1x128xf32> to vector<8x128xf32>
    %5 = arith.addf %2, %4 : vector<8x128xf32>
    %cst_5 = arith.constant 0.000000e+00 : f32
    %6 = vector.broadcast %cst_5 : f32 to vector<8x128xf32>
    %7 = arith.maximumf %5, %6 : vector<8x128xf32>
    %c0_6 = arith.constant 0 : index
    %c0_7 = arith.constant 0 : index
    %8 = vector.load %arg4[%c0_6, %c0_7] : memref<128x128xf32, #tpu.memory_space<vmem>>, vector<128x128xf32>
    %cst_8 = arith.constant dense<0.000000e+00> : vector<8x128xf32>
    %9 = tpu.matmul %7, %8, %cst_8 {dimension_numbers = #tpu.dot_dimension_numbers<[1], [0], [0], [1], [0, 0, 1, 1], [], []>} : vector<8x128xf32>, vector<128x128xf32>, vector<8x128xf32> -> vector<8x128xf32>
    %c0_9 = arith.constant 0 : index
    %c0_10 = arith.constant 0 : index
    %10 = vector.load %arg5[%c0_9, %c0_10] : memref<1x128xf32, #tpu.memory_space<vmem>>, vector<1x128xf32>
    %11 = vector.broadcast %10 : vector<1x128xf32> to vector<8x128xf32>
    %12 = arith.addf %9, %11 : vector<8x128xf32>
    %cst_11 = arith.constant 0.000000e+00 : f32
    %13 = vector.broadcast %cst_11 : f32 to vector<8x128xf32>
    %14 = arith.maximumf %12, %13 : vector<8x128xf32>
    %c0_12 = arith.constant 0 : index
    %c0_13 = arith.constant 0 : index
    %15 = vector.load %arg6[%c0_12, %c0_13] : memref<128x128xf32, #tpu.memory_space<vmem>>, vector<128x128xf32>
    %cst_14 = arith.constant dense<0.000000e+00> : vector<8x128xf32>
    %16 = tpu.matmul %14, %15, %cst_14 {dimension_numbers = #tpu.dot_dimension_numbers<[1], [0], [0], [1], [0, 0, 1, 1], [], []>} : vector<8x128xf32>, vector<128x128xf32>, vector<8x128xf32> -> vector<8x128xf32>
    %c0_15 = arith.constant 0 : index
    %c0_16 = arith.constant 0 : index
    %17 = vector.load %arg7[%c0_15, %c0_16] : memref<1x128xf32, #tpu.memory_space<vmem>>, vector<1x128xf32>
    %18 = vector.broadcast %17 : vector<1x128xf32> to vector<8x128xf32>
    %19 = arith.addf %16, %18 : vector<8x128xf32>
    %c0_17 = arith.constant 0 : index
    %c0_18 = arith.constant 0 : index
    %20 = vector.load %arg8[%c0_17, %c0_18] : memref<8x128xf32, #tpu.memory_space<vmem>>, vector<8x128xf32>
    tpu.vector_store %arg8[%c0_17, %c0_18], %19 {strides = array<i32>} : memref<8x128xf32, #tpu.memory_space<vmem>>, vector<8x128xf32>,
    return
  }
  func.func @transform_0(%arg0: i32) -> (i32, i32) {
    %c0_i32 = arith.constant 0 : i32
    %c0_i32_0 = arith.constant 0 : i32
    %c0_i32_1 = arith.constant 0 : i32
    return %c0_i32, %c0_i32_0 : i32, i32
  }
  func.func @transform_1(%arg0: i32) -> (i32, i32) {
    %c0_i32 = arith.constant 0 : i32
    %c0_i32_0 = arith.constant 0 : i32
    %c0_i32_1 = arith.constant 0 : i32
    return %c0_i32, %c0_i32_0 : i32, i32
  }
  func.func @transform_2(%arg0: i32) -> (i32, i32) {
    %c0_i32 = arith.constant 0 : i32
    %c0_i32_0 = arith.constant 0 : i32
    %c0_i32_1 = arith.constant 0 : i32
    return %c0_i32, %c0_i32_0 : i32, i32
  }
  func.func @transform_3(%arg0: i32) -> (i32, i32) {
    %c0_i32 = arith.constant 0 : i32
    %c0_i32_0 = arith.constant 0 : i32
    %c0_i32_1 = arith.constant 0 : i32
    return %c0_i32, %c0_i32_0 : i32, i32
  }
  func.func @transform_4(%arg0: i32) -> (i32, i32) {
    %c0_i32 = arith.constant 0 : i32
    %c0_i32_0 = arith.constant 0 : i32
    %c0_i32_1 = arith.constant 0 : i32
    return %c0_i32, %c0_i32_0 : i32, i32
  }
  func.func @transform_5(%arg0: i32) -> (i32, i32) {
    %c0_i32 = arith.constant 0 : i32
    %c0_i32_0 = arith.constant 0 : i32
    %c0_i32_1 = arith.constant 0 : i32
    return %c0_i32, %c0_i32_0 : i32, i32
  }
  func.func @transform_6(%arg0: i32) -> (i32, i32) {
    %c0_i32 = arith.constant 0 : i32
    %c0_i32_0 = arith.constant 0 : i32
    %c0_i32_1 = arith.constant 0 : i32
    return %c0_i32, %c0_i32_0 : i32, i32
  }
  func.func @transform_7(%arg0: i32) -> (i32, i32) {
    %c0_i32 = arith.constant 0 : i32
    %c0_i32_0 = arith.constant 0 : i32
    %c0_i32_1 = arith.constant 0 : i32
    return %c0_i32, %c0_i32_0 : i32, i32
  }
}

</mosaic_0001>

<bundles_post_ra>
// kernel: lenet_forward.5
= control target key start
LH: loop header
LB: loop body
LE: loop exit
PB: predicated region body
PF: predicated region fallthrough
CT: control target
= control target key end

     0   :  { %s798_s12 = smov 0   ;;  %s975_s0 = inlined_call_operand.vmem [shape: f32[1792,128], index: 0, kind: input, shape index: {}]   ;;  %s976_s1 = inlined_call_operand.vmem [shape: f32[128,128], index: 1, kind: input, shape index: {}]   ;;  %s977_s2 = inlined_call_operand.vmem [shape: f32[1,128], index: 2, kind: input, shape index: {}]   ;;  %s978_s3 = inlined_call_operand.vmem [shape: f32[1792,128], index: 3, kind: output, shape index: {}]  }
   0x1 LB: > { %s574_s13 = sadd.s32 4294967295, %s776_s12   ;;  %p578_p0 = scmp.ge.s32.totalorder %s776_s12, 1  ;;  %s776_s12 = sphi %s798_s12, %s13_s12  }
   0x2   : > { %p138_p1 = scmp.lt.s32.totalorder %s776_s12, 8 }
   0x4   : > { %p139_p2 = pnand %p578_p0, %p138_p1 }
   0x5   : > { %v206_v0 = vld [vmem:[%s976_s1] sm:$0xff] (!%p139_p2)  ;;  %v207_v1 = vld [vmem:[%s976_s1 + $0x8] sm:$0xff] (!%p139_p2)  ;;  %v208_v2 = vld [vmem:[%s976_s1 + $0x10] sm:$0xff] (!%p139_p2)  ;;  %s579_s20 = sshll.u32 (!%p139_p2), %s574_s13, 5 }
   0x6   : > { %142 = sbr.rel (%p139_p2) target bundleno = 287 (0x11f), region = 32  ;;  %v714_v3 = vpack.c.bf16 (!%p139_p2), %v207_v1, %v206_v0  ;;  %v209_v4 = vld [vmem:[%s976_s1 + $0x18] sm:$0xff] (!%p139_p2)  ;;  %p163_p3 = scmp.lt.s32.totalorder (!%p139_p2), %s579_s20, 223  ;;  %v210_v6 = vld [vmem:[%s976_s1 + $0x20] sm:$0xff] (!%p139_p2)  ;;  %v211_v7 = vld [vmem:[%s976_s1 + $0x28] sm:$0xff] (!%p139_p2) }
   0x7   : > { %v718_v5 = vpack.c.bf16 (!%p139_p2), %v209_v4, %v208_v2  ;;  %v722_v8 = vpack.c.bf16 (!%p139_p2), %v211_v7, %v210_v6  ;;  %v212_v9 = vld [vmem:[%s976_s1 + $0x30] sm:$0xff] (!%p139_p2)  ;;  %v213_v10 = vld [vmem:[%s976_s1 + $0x38] sm:$0xff] (!%p139_p2)  ;;  %v214_v14 = vld [vmem:[%s976_s1 + $0x40] sm:$0xff] (!%p139_p2) }
   0x8   : > { %715 = vmatprep.subr.bf16.mxu0 (!%p139_p2), %v714_v3  ;;  %746 = vmatprep.subr.bf16.mxu1 (!%p139_p2), %v714_v3  ;;  %v726_v13 = vpack.c.bf16 (!%p139_p2), %v213_v10, %v212_v9  ;;  %v215_v15 = vld [vmem:[%s976_s1 + $0x48] sm:$0xff] (!%p139_p2)  ;;  %v216_v17 = vld [vmem:[%s976_s1 + $0x50] sm:$0xff] (!%p139_p2)  ;;  %v217_v18 = vld [vmem:[%s976_s1 + $0x58] sm:$0xff] (!%p139_p2) }
   0x9   : > { %717 = vmatpush3.bf16.msra.mxu0 (!%p139_p2), %v714_v3  ;;  %754 = vmatpush3.bf16.msra.mxu1 (!%p139_p2), %v714_v3  ;;  %v730_v16 = vpack.c.bf16 (!%p139_p2), %v215_v15, %v214_v14  ;;  %v734_v19 = vpack.c.bf16 (!%p139_p2), %v217_v18, %v216_v17  ;;  %v218_v20 = vld [vmem:[%s976_s1 + $0x60] sm:$0xff] (!%p139_p2)  ;;  %v219_v21 = vld [vmem:[%s976_s1 + $0x68] sm:$0xff] (!%p139_p2)  ;;  %v220_v23 = vld [vmem:[%s976_s1 + $0x70] sm:$0xff] (!%p139_p2) }
   0xa   : > { %719 = vmatprep.subr.bf16.mxu0 (!%p139_p2), %v718_v5  ;;  %747 = vmatprep.subr.bf16.mxu1 (!%p139_p2), %v718_v5  ;;  %v738_v22 = vpack.c.bf16 (!%p139_p2), %v219_v21, %v218_v20  ;;  %v221_v24 = vld [vmem:[%s976_s1 + $0x78] sm:$0xff] (!%p139_p2)  ;;  %v899_v56 = vld [vmem:[%s977_s2] ss:$0 sm:$0xff] (!%p139_p2) }
   0xb   : > { %v742_v25 = vpack.c.bf16 (!%p139_p2), %v221_v24, %v220_v23 }
   0xd   : > { %s980_s20 = smov (!%p163_p3, %s579_s20), 223  ;;  %721 = vmatpush3.bf16.msra.mxu0 %v718_v5  ;;  %755 = vmatpush3.bf16.msra.mxu1 %v718_v5 }
   0xe   : > { %s580_s27 = sshll.u32 %s980_s20, 3  ;;  %723 = vmatprep.subr.bf16.mxu0 %v722_v8  ;;  %748 = vmatprep.subr.bf16.mxu1 %v722_v8 }
   0xf   : > { %s838_s7 = scalar_lea.vmem %s975_s0, %s580_s27  ;;  %s908_s4 = scalar_lea.vmem %s978_s3, %s580_s27 }
  0x10   : > { %v174_v11 = vld [vmem:[%s838_s7] sm:$0xff]  ;;  %v175_v26 = vld [vmem:[%s838_s7 + $0x8] sm:$0xff]  ;;  %v176_v28 = vld [vmem:[%s838_s7 + $0x10] sm:$0xff] }
  0x11   : > { %v190_v12 = vld [vmem:[%s838_s7 + $0x80] sm:$0xff]  ;;  %666 = vmatprep.mubr.f32.mxu0 %v174_v11  ;;  %725 = vmatpush3.bf16.msra.mxu0 %v722_v8  ;;  %v191_v27 = vld [vmem:[%s838_s7 + $0x88] sm:$0xff]  ;;  %v192_v29 = vld [vmem:[%s838_s7 + $0x90] sm:$0xff] }
  0x12   : > { %690 = vmatprep.mubr.f32.mxu1 %v190_v12  ;;  %756 = vmatpush3.bf16.msra.mxu1 %v722_v8  ;;  %v177_v30 = vld [vmem:[%s838_s7 + $0x18] sm:$0xff]  ;;  %v178_v32 = vld [vmem:[%s838_s7 + $0x20] sm:$0xff]  ;;  %v179_v34 = vld [vmem:[%s838_s7 + $0x28] sm:$0xff] }
  0x13   : > { %727 = vmatprep.subr.bf16.mxu0 %v726_v13  ;;  %749 = vmatprep.subr.bf16.mxu1 %v726_v13  ;;  %v193_v31 = vld [vmem:[%s838_s7 + $0x98] sm:$0xff]  ;;  %v194_v33 = vld [vmem:[%s838_s7 + $0xa0] sm:$0xff]  ;;  %v195_v35 = vld [vmem:[%s838_s7 + $0xa8] sm:$0xff] }
  0x14   : > { %v180_v36 = vld [vmem:[%s838_s7 + $0x30] sm:$0xff]  ;;  %v181_v38 = vld [vmem:[%s838_s7 + $0x38] sm:$0xff]  ;;  %v182_v40 = vld [vmem:[%s838_s7 + $0x40] sm:$0xff] }
  0x15   : > { %729 = vmatpush3.bf16.msra.mxu0 %v726_v13  ;;  %v196_v37 = vld [vmem:[%s838_s7 + $0xb0] sm:$0xff]  ;;  %v197_v39 = vld [vmem:[%s838_s7 + $0xb8] sm:$0xff]  ;;  %v198_v41 = vld [vmem:[%s838_s7 + $0xc0] sm:$0xff] }
  0x16   : > { %757 = vmatpush3.bf16.msra.mxu1 %v726_v13  ;;  %731 = vmatprep.subr.bf16.mxu0 %v730_v16  ;;  %v183_v42 = vld [vmem:[%s838_s7 + $0x48] sm:$0xff]  ;;  %v184_v44 = vld [vmem:[%s838_s7 + $0x50] sm:$0xff]  ;;  %v185_v46 = vld [vmem:[%s838_s7 + $0x58] sm:$0xff] }
  0x17   : > { %750 = vmatprep.subr.bf16.mxu1 %v730_v16  ;;  %v199_v43 = vld [vmem:[%s838_s7 + $0xc8] sm:$0xff]  ;;  %v200_v45 = vld [vmem:[%s838_s7 + $0xd0] sm:$0xff]  ;;  %v201_v47 = vld [vmem:[%s838_s7 + $0xd8] sm:$0xff] }
  0x18   : > { %v186_v48 = vld [vmem:[%s838_s7 + $0x60] sm:$0xff]  ;;  %v187_v50 = vld [vmem:[%s838_s7 + $0x68] sm:$0xff]  ;;  %v188_v52 = vld [vmem:[%s838_s7 + $0x70] sm:$0xff] }
  0x19   : > { %733 = vmatpush3.bf16.msra.mxu0 %v730_v16  ;;  %v202_v49 = vld [vmem:[%s838_s7 + $0xe0] sm:$0xff]  ;;  %v203_v51 = vld [vmem:[%s838_s7 + $0xe8] sm:$0xff]  ;;  %v204_v53 = vld [vmem:[%s838_s7 + $0xf0] sm:$0xff] }
  0x1a   : > { %758 = vmatpush3.bf16.msra.mxu1 %v730_v16  ;;  %735 = vmatprep.subr.bf16.mxu0 %v734_v19  ;;  %v189_v54 = vld [vmem:[%s838_s7 + $0x78] sm:$0xff] }
  0x1b   : > { %751 = vmatprep.subr.bf16.mxu1 %v734_v19  ;;  %v205_v55 = vld [vmem:[%s838_s7 + $0xf8] sm:$0xff] }
  0x1d   : > { %737 = vmatpush3.bf16.msra.mxu0 %v734_v19 }
  0x1e   : > { %759 = vmatpush3.bf16.msra.mxu1 %v734_v19  ;;  %739 = vmatprep.subr.bf16.mxu0 %v738_v22 }
  0x1f   : > { %752 = vmatprep.subr.bf16.mxu1 %v738_v22 }
  0x21   : > { %741 = vmatpush3.bf16.msra.mxu0 %v738_v22 }
  0x22   : > { %760 = vmatpush3.bf16.msra.mxu1 %v738_v22  ;;  %743 = vmatprep.subr.bf16.mxu0 %v742_v25 }
  0x23   : > { %753 = vmatprep.subr.bf16.mxu1 %v742_v25 }
  0x25   : > { %745 = vmatpush3.bf16.msra.mxu0 %v742_v25 }
  0x26   : > { %761 = vmatpush3.bf16.msra.mxu1 %v742_v25 }
  0x28   : > { %667 = vmatmul.mubr.f32.vlgmr.msra.gmra.mrb[0].mxu0 %v175_v26 }
  0x29   : > { %691 = vmatmul.mubr.f32.vlgmr.msra.gmra.mrb[0].mxu1 %v191_v27  ;;  %669 = vmatprep.mubr.f32.mxu0 %v176_v28 }
  0x2a   : > { %693 = vmatprep.mubr.f32.mxu1 %v192_v29 }
  0x2c   : > { %670 = vmatmul.mubr.f32.gmra.mrb[2].mxu0 %v177_v30 }
  0x2d   : > { %694 = vmatmul.mubr.f32.gmra.mrb[2].mxu1 %v193_v31  ;;  %672 = vmatprep.mubr.f32.mxu0 %v178_v32 }
  0x2e   : > { %696 = vmatprep.mubr.f32.mxu1 %v194_v33 }
  0x30   : > { %673 = vmatmul.mubr.f32.gmra.mrb[4].mxu0 %v179_v34 }
  0x31   : > { %697 = vmatmul.mubr.f32.gmra.mrb[4].mxu1 %v195_v35  ;;  %675 = vmatprep.mubr.f32.mxu0 %v180_v36 }
  0x32   : > { %699 = vmatprep.mubr.f32.mxu1 %v196_v37 }
  0x34   : > { %676 = vmatmul.mubr.f32.gmra.mrb[6].mxu0 %v181_v38 }
  0x35   : > { %700 = vmatmul.mubr.f32.gmra.mrb[6].mxu1 %v197_v39  ;;  %678 = vmatprep.mubr.f32.mxu0 %v182_v40 }
  0x36   : > { %702 = vmatprep.mubr.f32.mxu1 %v198_v41 }
  0x38   : > { %679 = vmatmul.mubr.f32.gmra.mrb[8].mxu0 %v183_v42 }
  0x39   : > { %703 = vmatmul.mubr.f32.gmra.mrb[8].mxu1 %v199_v43  ;;  %681 = vmatprep.mubr.f32.mxu0 %v184_v44 }
  0x3a   : > { %705 = vmatprep.mubr.f32.mxu1 %v200_v45 }
  0x3c   : > { %682 = vmatmul.mubr.f32.gmra.mrb[10].mxu0 %v185_v46 }
  0x3d   : > { %706 = vmatmul.mubr.f32.gmra.mrb[10].mxu1 %v201_v47  ;;  %684 = vmatprep.mubr.f32.mxu0 %v186_v48 }
  0x3e   : > { %708 = vmatprep.mubr.f32.mxu1 %v202_v49 }
  0x40   : > { %685 = vmatmul.mubr.f32.gmra.mrb[12].mxu0 %v187_v50 }
  0x41   : > { %709 = vmatmul.mubr.f32.gmra.mrb[12].mxu1 %v203_v51  ;;  %687 = vmatprep.mubr.f32.mxu0 %v188_v52 }
  0x42   : > { %711 = vmatprep.mubr.f32.mxu1 %v204_v53 }
  0x44   : > { %688 = vmatmul.mubr.f32.gmra.mrb[14].mxu0 %v189_v54 }
  0x45   : > { %712 = vmatmul.mubr.f32.gmra.mrb[14].mxu1 %v205_v55 }
  0xfb   : > { %v668_v57 = vpop.f32.mrb[0].mxu0 }
  0xfc   : > { %v692_v58 = vpop.f32.mrb[0].mxu1  ;;  %v301_v59 = vadd.f32 %v668_v57, %v899_v56  ;;  %v295_v61 = vpop.f32.mrb[1].mxu0 }
  0xfd   : > { %v381_v60 = vadd.f32 %v692_v58, %v899_v56  ;;  %v375_v62 = vpop.f32.mrb[1].mxu1  ;;  %v296_v63 = vadd.f32 %v899_v56, %v295_v61 }
  0xfe   : > { %v376_v0 = vadd.f32 %v899_v56, %v375_v62  ;;  %v455_v1 = vmax.f32 %v301_v59, 0.0 }
  0xff   : > { %v471_v2 = vmax.f32 %v381_v60, 0.0  ;;  %v454_v3 = vmax.f32 %v296_v63, 0.0  ;;  %v671_v5 = vpop.f32.mrb[2].mxu0 }
 0x100   : > { %v470_v4 = vmax.f32 %v376_v0, 0.0  ;;  %v695_v6 = vpop.f32.mrb[2].mxu1  ;;  %487 = vst [vmem:[%s908_s4 + $0x8] sm:$0xff] %v455_v1  ;;  %v311_v7 = vadd.f32 %v671_v5, %v899_v56  ;;  %v305_v9 = vpop.f32.mrb[3].mxu0 }
 0x101   : > { %503 = vst [vmem:[%s908_s4 + $0x88] sm:$0xff] %v471_v2  ;;  %v391_v8 = vadd.f32 %v695_v6, %v899_v56  ;;  %v385_v10 = vpop.f32.mrb[3].mxu1  ;;  %486 = vst [vmem:[%s908_s4] sm:$0xff] %v454_v3  ;;  %v306_v11 = vadd.f32 %v899_v56, %v305_v9 }
 0x102   : > { %502 = vst [vmem:[%s908_s4 + $0x80] sm:$0xff] %v470_v4  ;;  %v386_v12 = vadd.f32 %v899_v56, %v385_v10  ;;  %v457_v13 = vmax.f32 %v311_v7, 0.0 }
 0x103   : > { %v473_v14 = vmax.f32 %v391_v8, 0.0  ;;  %v456_v15 = vmax.f32 %v306_v11, 0.0  ;;  %v674_v17 = vpop.f32.mrb[4].mxu0 }
 0x104   : > { %v472_v16 = vmax.f32 %v386_v12, 0.0  ;;  %v698_v18 = vpop.f32.mrb[4].mxu1  ;;  %489 = vst [vmem:[%s908_s4 + $0x18] sm:$0xff] %v457_v13  ;;  %v321_v19 = vadd.f32 %v674_v17, %v899_v56  ;;  %v315_v21 = vpop.f32.mrb[5].mxu0 }
 0x105   : > { %505 = vst [vmem:[%s908_s4 + $0x98] sm:$0xff] %v473_v14  ;;  %v401_v20 = vadd.f32 %v698_v18, %v899_v56  ;;  %v395_v22 = vpop.f32.mrb[5].mxu1  ;;  %488 = vst [vmem:[%s908_s4 + $0x10] sm:$0xff] %v456_v15  ;;  %v316_v23 = vadd.f32 %v899_v56, %v315_v21 }
 0x106   : > { %504 = vst [vmem:[%s908_s4 + $0x90] sm:$0xff] %v472_v16  ;;  %v396_v24 = vadd.f32 %v899_v56, %v395_v22  ;;  %v459_v25 = vmax.f32 %v321_v19, 0.0 }
 0x107   : > { %v475_v26 = vmax.f32 %v401_v20, 0.0  ;;  %v458_v27 = vmax.f32 %v316_v23, 0.0  ;;  %v677_v29 = vpop.f32.mrb[6].mxu0 }
 0x108   : > { %v474_v28 = vmax.f32 %v396_v24, 0.0  ;;  %v701_v30 = vpop.f32.mrb[6].mxu1  ;;  %491 = vst [vmem:[%s908_s4 + $0x28] sm:$0xff] %v459_v25  ;;  %v331_v31 = vadd.f32 %v677_v29, %v899_v56  ;;  %v325_v33 = vpop.f32.mrb[7].mxu0 }
 0x109   : > { %507 = vst [vmem:[%s908_s4 + $0xa8] sm:$0xff] %v475_v26  ;;  %v411_v32 = vadd.f32 %v701_v30, %v899_v56  ;;  %v405_v34 = vpop.f32.mrb[7].mxu1  ;;  %490 = vst [vmem:[%s908_s4 + $0x20] sm:$0xff] %v458_v27  ;;  %v326_v35 = vadd.f32 %v899_v56, %v325_v33 }
 0x10a   : > { %506 = vst [vmem:[%s908_s4 + $0xa0] sm:$0xff] %v474_v28  ;;  %v406_v36 = vadd.f32 %v899_v56, %v405_v34  ;;  %v461_v37 = vmax.f32 %v331_v31, 0.0 }
 0x10b   : > { %v477_v38 = vmax.f32 %v411_v32, 0.0  ;;  %v460_v39 = vmax.f32 %v326_v35, 0.0  ;;  %v680_v41 = vpop.f32.mrb[8].mxu0 }
 0x10c   : > { %v476_v40 = vmax.f32 %v406_v36, 0.0  ;;  %v704_v42 = vpop.f32.mrb[8].mxu1  ;;  %493 = vst [vmem:[%s908_s4 + $0x38] sm:$0xff] %v461_v37  ;;  %v341_v43 = vadd.f32 %v680_v41, %v899_v56  ;;  %v335_v45 = vpop.f32.mrb[9].mxu0 }
 0x10d   : > { %509 = vst [vmem:[%s908_s4 + $0xb8] sm:$0xff] %v477_v38  ;;  %v421_v44 = vadd.f32 %v704_v42, %v899_v56  ;;  %v415_v46 = vpop.f32.mrb[9].mxu1  ;;  %492 = vst [vmem:[%s908_s4 + $0x30] sm:$0xff] %v460_v39  ;;  %v336_v47 = vadd.f32 %v899_v56, %v335_v45 }
 0x10e   : > { %508 = vst [vmem:[%s908_s4 + $0xb0] sm:$0xff] %v476_v40  ;;  %v416_v48 = vadd.f32 %v899_v56, %v415_v46  ;;  %v463_v49 = vmax.f32 %v341_v43, 0.0 }
 0x10f   : > { %v479_v50 = vmax.f32 %v421_v44, 0.0  ;;  %v462_v51 = vmax.f32 %v336_v47, 0.0  ;;  %v683_v53 = vpop.f32.mrb[10].mxu0 }
 0x110   : > { %v478_v52 = vmax.f32 %v416_v48, 0.0  ;;  %v707_v54 = vpop.f32.mrb[10].mxu1  ;;  %495 = vst [vmem:[%s908_s4 + $0x48] sm:$0xff] %v463_v49  ;;  %v351_v55 = vadd.f32 %v683_v53, %v899_v56  ;;  %v345_v58 = vpop.f32.mrb[11].mxu0 }
 0x111   : > { %511 = vst [vmem:[%s908_s4 + $0xc8] sm:$0xff] %v479_v50  ;;  %v431_v57 = vadd.f32 %v707_v54, %v899_v56  ;;  %v425_v59 = vpop.f32.mrb[11].mxu1  ;;  %494 = vst [vmem:[%s908_s4 + $0x40] sm:$0xff] %v462_v51  ;;  %v346_v60 = vadd.f32 %v899_v56, %v345_v58 }
 0x112   : > { %510 = vst [vmem:[%s908_s4 + $0xc0] sm:$0xff] %v478_v52  ;;  %v426_v61 = vadd.f32 %v899_v56, %v425_v59  ;;  %v465_v62 = vmax.f32 %v351_v55, 0.0 }
 0x113   : > { %v481_v63 = vmax.f32 %v431_v57, 0.0  ;;  %v464_v0 = vmax.f32 %v346_v60, 0.0  ;;  %v686_v2 = vpop.f32.mrb[12].mxu0 }
 0x114   : > { %v480_v1 = vmax.f32 %v426_v61, 0.0  ;;  %v710_v3 = vpop.f32.mrb[12].mxu1  ;;  %497 = vst [vmem:[%s908_s4 + $0x58] sm:$0xff] %v465_v62  ;;  %v361_v4 = vadd.f32 %v686_v2, %v899_v56  ;;  %v355_v6 = vpop.f32.mrb[13].mxu0 }
 0x115   : > { %513 = vst [vmem:[%s908_s4 + $0xd8] sm:$0xff] %v481_v63  ;;  %v441_v5 = vadd.f32 %v710_v3, %v899_v56  ;;  %v435_v7 = vpop.f32.mrb[13].mxu1  ;;  %496 = vst [vmem:[%s908_s4 + $0x50] sm:$0xff] %v464_v0  ;;  %v356_v8 = vadd.f32 %v899_v56, %v355_v6 }
 0x116   : > { %512 = vst [vmem:[%s908_s4 + $0xd0] sm:$0xff] %v480_v1  ;;  %v436_v9 = vadd.f32 %v899_v56, %v435_v7  ;;  %v467_v10 = vmax.f32 %v361_v4, 0.0 }
 0x117   : > { %v483_v11 = vmax.f32 %v441_v5, 0.0  ;;  %v466_v12 = vmax.f32 %v356_v8, 0.0  ;;  %v689_v14 = vpop.f32.mrb[14].mxu0 }
 0x118   : > { %v482_v13 = vmax.f32 %v436_v9, 0.0  ;;  %v713_v15 = vpop.f32.mrb[14].mxu1  ;;  %499 = vst [vmem:[%s908_s4 + $0x68] sm:$0xff] %v467_v10  ;;  %v371_v16 = vadd.f32 %v689_v14, %v899_v56  ;;  %v365_v18 = vpop.f32.mrb[15].mxu0 }
 0x119   : > { %515 = vst [vmem:[%s908_s4 + $0xe8] sm:$0xff] %v483_v11  ;;  %v451_v17 = vadd.f32 %v713_v15, %v899_v56  ;;  %v445_v19 = vpop.f32.mrb[15].mxu1  ;;  %498 = vst [vmem:[%s908_s4 + $0x60] sm:$0xff] %v466_v12  ;;  %v366_v20 = vadd.f32 %v899_v56, %v365_v18 }
 0x11a   : > { %514 = vst [vmem:[%s908_s4 + $0xe0] sm:$0xff] %v482_v13  ;;  %v446_v21 = vadd.f32 %v899_v56, %v445_v19  ;;  %v469_v22 = vmax.f32 %v371_v16, 0.0 }
 0x11b   : > { %v485_v23 = vmax.f32 %v451_v17, 0.0  ;;  %v468_v24 = vmax.f32 %v366_v20, 0.0 }
 0x11c   : > { %v484_v25 = vmax.f32 %v446_v21, 0.0  ;;  %501 = vst [vmem:[%s908_s4 + $0x78] sm:$0xff] %v469_v22 }
 0x11d   : > { %517 = vst [vmem:[%s908_s4 + $0xf8] sm:$0xff] %v485_v23  ;;  %500 = vst [vmem:[%s908_s4 + $0x70] sm:$0xff] %v468_v24 }
 0x11e   : > { %516 = vst [vmem:[%s908_s4 + $0xf0] sm:$0xff] %v484_v25 }
 0x11f PF: > { %s13_s12 = sadd.s32 1, %s776_s12  }
 0x120   : > { %p10_p4 = scmp.ge.s32.totalorder %s13_s12, 9  }
 0x122   :  { %12 = sbr.rel (!%p10_p4) target bundleno = 1 (0x1), region = 62 }

// kernel: lenet_forward.6
= control target key start
LH: loop header
LB: loop body
LE: loop exit
PB: predicated region body
PF: predicated region fallthrough
CT: control target
= control target key end

     0   :  { %s1173_s0 = inlined_call_operand.vmem [shape: f32[392,128], index: 0, kind: input, shape index: {}]   ;;  %s1174_s1 = inlined_call_operand.vmem [shape: f32[392,128], index: 1, kind: input, shape index: {}]   ;;  %s1175_s2 = inlined_call_operand.vmem [shape: f32[392,128], index: 2, kind: input, shape index: {}]   ;;  %s1176_s3 = inlined_call_operand.vmem [shape: f32[392,128], index: 3, kind: input, shape index: {}]   ;;  %s1177_s4 = inlined_call_operand.vmem [shape: f32[392,128], index: 4, kind: output, shape index: {}]  }
   0x1   :  { %v17_v0 = vld [vmem:[%s1173_s0] sm:$0xff]  ;;  %v18_v5 = vld [vmem:[%s1173_s0 + $0x8] sm:$0xff]  ;;  %v19_v11 = vld [vmem:[%s1173_s0 + $0x10] sm:$0xff] }
   0x2   :  { %v66_v1 = vld [vmem:[%s1174_s1] sm:$0xff]  ;;  %v67_v6 = vld [vmem:[%s1174_s1 + $0x8] sm:$0xff]  ;;  %v68_v13 = vld [vmem:[%s1174_s1 + $0x10] sm:$0xff] }
   0x3   :  { %v164_v2 = vld [vmem:[%s1175_s2] sm:$0xff]  ;;  %v115_v3 = vmax.f32 %v17_v0, %v66_v1  ;;  %v116_v8 = vmax.f32 %v18_v5, %v67_v6  ;;  %v165_v9 = vld [vmem:[%s1175_s2 + $0x8] sm:$0xff]  ;;  %v166_v14 = vld [vmem:[%s1175_s2 + $0x10] sm:$0xff]  ;;  %v117_v17 = vmax.f32 %v19_v11, %v68_v13 }
   0x4   :  { %v213_v4 = vld [vmem:[%s1176_s3] sm:$0xff]  ;;  %v214_v10 = vld [vmem:[%s1176_s3 + $0x8] sm:$0xff]  ;;  %v215_v15 = vld [vmem:[%s1176_s3 + $0x10] sm:$0xff] }
   0x5   :  { %v262_v7 = vmax.f32 %v164_v2, %v213_v4  ;;  %v263_v12 = vmax.f32 %v165_v9, %v214_v10  ;;  %v264_v18 = vmax.f32 %v166_v14, %v215_v15  ;;  %v20_v19 = vld [vmem:[%s1173_s0 + $0x18] sm:$0xff]  ;;  %v21_v25 = vld [vmem:[%s1173_s0 + $0x20] sm:$0xff]  ;;  %v22_v32 = vld [vmem:[%s1173_s0 + $0x28] sm:$0xff] }
   0x6   :  { %v69_v20 = vld [vmem:[%s1174_s1 + $0x18] sm:$0xff]  ;;  %v70_v26 = vld [vmem:[%s1174_s1 + $0x20] sm:$0xff]  ;;  %v71_v34 = vld [vmem:[%s1174_s1 + $0x28] sm:$0xff] }
   0x7   :  { %v311_v16 = vmax.f32 %v115_v3, %v262_v7  ;;  %v167_v21 = vld [vmem:[%s1175_s2 + $0x18] sm:$0xff]  ;;  %v312_v22 = vmax.f32 %v116_v8, %v263_v12  ;;  %v118_v23 = vmax.f32 %v20_v19, %v69_v20  ;;  %v313_v27 = vmax.f32 %v117_v17, %v264_v18  ;;  %v168_v30 = vld [vmem:[%s1175_s2 + $0x20] sm:$0xff]  ;;  %v169_v35 = vld [vmem:[%s1175_s2 + $0x28] sm:$0xff] }
   0x8   :  { %v216_v24 = vld [vmem:[%s1176_s3 + $0x18] sm:$0xff]  ;;  %v119_v29 = vmax.f32 %v21_v25, %v70_v26  ;;  %v217_v31 = vld [vmem:[%s1176_s3 + $0x20] sm:$0xff]  ;;  %v218_v36 = vld [vmem:[%s1176_s3 + $0x28] sm:$0xff]  ;;  %v120_v38 = vmax.f32 %v22_v32, %v71_v34 }
   0x9   :  { %360 = vst [vmem:[%s1177_s4] sm:$0xff] %v311_v16  ;;  %v265_v28 = vmax.f32 %v167_v21, %v216_v24  ;;  %361 = vst [vmem:[%s1177_s4 + $0x8] sm:$0xff] %v312_v22  ;;  %v266_v33 = vmax.f32 %v168_v30, %v217_v31  ;;  %v267_v39 = vmax.f32 %v169_v35, %v218_v36  ;;  %v23_v40 = vld [vmem:[%s1173_s0 + $0x30] sm:$0xff]  ;;  %v24_v46 = vld [vmem:[%s1173_s0 + $0x38] sm:$0xff] }
   0xa   :  { %362 = vst [vmem:[%s1177_s4 + $0x10] sm:$0xff] %v313_v27  ;;  %v72_v41 = vld [vmem:[%s1174_s1 + $0x30] sm:$0xff]  ;;  %v73_v47 = vld [vmem:[%s1174_s1 + $0x38] sm:$0xff]  ;;  %v25_v53 = vld [vmem:[%s1173_s0 + $0x40] sm:$0xff] }
   0xb   :  { %v314_v37 = vmax.f32 %v118_v23, %v265_v28  ;;  %v170_v42 = vld [vmem:[%s1175_s2 + $0x30] sm:$0xff]  ;;  %v315_v43 = vmax.f32 %v119_v29, %v266_v33  ;;  %v121_v44 = vmax.f32 %v23_v40, %v72_v41  ;;  %v316_v48 = vmax.f32 %v120_v38, %v267_v39  ;;  %v171_v51 = vld [vmem:[%s1175_s2 + $0x38] sm:$0xff]  ;;  %v74_v55 = vld [vmem:[%s1174_s1 + $0x40] sm:$0xff] }
   0xc   :  { %v219_v45 = vld [vmem:[%s1176_s3 + $0x30] sm:$0xff]  ;;  %v122_v50 = vmax.f32 %v24_v46, %v73_v47  ;;  %v220_v52 = vld [vmem:[%s1176_s3 + $0x38] sm:$0xff]  ;;  %v172_v56 = vld [vmem:[%s1175_s2 + $0x40] sm:$0xff]  ;;  %v123_v59 = vmax.f32 %v25_v53, %v74_v55 }
   0xd   :  { %363 = vst [vmem:[%s1177_s4 + $0x18] sm:$0xff] %v314_v37  ;;  %v268_v49 = vmax.f32 %v170_v42, %v219_v45  ;;  %364 = vst [vmem:[%s1177_s4 + $0x20] sm:$0xff] %v315_v43  ;;  %v269_v54 = vmax.f32 %v171_v51, %v220_v52  ;;  %v221_v57 = vld [vmem:[%s1176_s3 + $0x40] sm:$0xff]  ;;  %v26_v61 = vld [vmem:[%s1173_s0 + $0x48] sm:$0xff] }
   0xe   :  { %365 = vst [vmem:[%s1177_s4 + $0x28] sm:$0xff] %v316_v48  ;;  %v270_v60 = vmax.f32 %v172_v56, %v221_v57  ;;  %v75_v62 = vld [vmem:[%s1174_s1 + $0x48] sm:$0xff]  ;;  %v27_v3 = vld [vmem:[%s1173_s0 + $0x50] sm:$0xff]  ;;  %v28_v10 = vld [vmem:[%s1173_s0 + $0x58] sm:$0xff] }
   0xf   :  { %v317_v58 = vmax.f32 %v121_v44, %v268_v49  ;;  %v173_v63 = vld [vmem:[%s1175_s2 + $0x48] sm:$0xff]  ;;  %v318_v0 = vmax.f32 %v122_v50, %v269_v54  ;;  %v124_v1 = vmax.f32 %v26_v61, %v75_v62  ;;  %v76_v4 = vld [vmem:[%s1174_s1 + $0x50] sm:$0xff]  ;;  %v77_v12 = vld [vmem:[%s1174_s1 + $0x58] sm:$0xff] }
  0x10   :  { %v222_v2 = vld [vmem:[%s1176_s3 + $0x48] sm:$0xff]  ;;  %v319_v5 = vmax.f32 %v123_v59, %v270_v60  ;;  %v125_v7 = vmax.f32 %v27_v3, %v76_v4  ;;  %v174_v8 = vld [vmem:[%s1175_s2 + $0x50] sm:$0xff]  ;;  %v175_v13 = vld [vmem:[%s1175_s2 + $0x58] sm:$0xff]  ;;  %v126_v16 = vmax.f32 %v28_v10, %v77_v12 }
  0x11   :  { %366 = vst [vmem:[%s1177_s4 + $0x30] sm:$0xff] %v317_v58  ;;  %v271_v6 = vmax.f32 %v173_v63, %v222_v2  ;;  %v223_v9 = vld [vmem:[%s1176_s3 + $0x50] sm:$0xff]  ;;  %367 = vst [vmem:[%s1177_s4 + $0x38] sm:$0xff] %v318_v0  ;;  %v224_v14 = vld [vmem:[%s1176_s3 + $0x58] sm:$0xff] }
  0x12   :  { %v272_v11 = vmax.f32 %v174_v8, %v223_v9  ;;  %368 = vst [vmem:[%s1177_s4 + $0x40] sm:$0xff] %v319_v5  ;;  %v273_v17 = vmax.f32 %v175_v13, %v224_v14  ;;  %v29_v18 = vld [vmem:[%s1173_s0 + $0x60] sm:$0xff]  ;;  %v30_v24 = vld [vmem:[%s1173_s0 + $0x68] sm:$0xff]  ;;  %v31_v31 = vld [vmem:[%s1173_s0 + $0x70] sm:$0xff] }
  0x13   :  { %v320_v15 = vmax.f32 %v124_v1, %v271_v6  ;;  %v78_v19 = vld [vmem:[%s1174_s1 + $0x60] sm:$0xff]  ;;  %v79_v25 = vld [vmem:[%s1174_s1 + $0x68] sm:$0xff]  ;;  %v80_v33 = vld [vmem:[%s1174_s1 + $0x70] sm:$0xff] }
  0x14   :  { %v176_v20 = vld [vmem:[%s1175_s2 + $0x60] sm:$0xff]  ;;  %v321_v21 = vmax.f32 %v125_v7, %v272_v11  ;;  %v127_v22 = vmax.f32 %v29_v18, %v78_v19  ;;  %v322_v26 = vmax.f32 %v126_v16, %v273_v17  ;;  %v128_v28 = vmax.f32 %v30_v24, %v79_v25  ;;  %v177_v29 = vld [vmem:[%s1175_s2 + $0x68] sm:$0xff]  ;;  %v178_v34 = vld [vmem:[%s1175_s2 + $0x70] sm:$0xff] }
  0x15   :  { %v225_v23 = vld [vmem:[%s1176_s3 + $0x60] sm:$0xff]  ;;  %369 = vst [vmem:[%s1177_s4 + $0x48] sm:$0xff] %v320_v15  ;;  %v226_v30 = vld [vmem:[%s1176_s3 + $0x68] sm:$0xff]  ;;  %v227_v35 = vld [vmem:[%s1176_s3 + $0x70] sm:$0xff]  ;;  %v129_v37 = vmax.f32 %v31_v31, %v80_v33 }
  0x16   :  { %v274_v27 = vmax.f32 %v176_v20, %v225_v23  ;;  %370 = vst [vmem:[%s1177_s4 + $0x50] sm:$0xff] %v321_v21  ;;  %v275_v32 = vmax.f32 %v177_v29, %v226_v30  ;;  %371 = vst [vmem:[%s1177_s4 + $0x58] sm:$0xff] %v322_v26  ;;  %v276_v38 = vmax.f32 %v178_v34, %v227_v35  ;;  %v32_v39 = vld [vmem:[%s1173_s0 + $0x78] sm:$0xff]  ;;  %v33_v45 = vld [vmem:[%s1173_s0 + $0x80] sm:$0xff] }
  0x17   :  { %v81_v40 = vld [vmem:[%s1174_s1 + $0x78] sm:$0xff]  ;;  %v82_v46 = vld [vmem:[%s1174_s1 + $0x80] sm:$0xff]  ;;  %v34_v52 = vld [vmem:[%s1173_s0 + $0x88] sm:$0xff] }
  0x18   :  { %v323_v36 = vmax.f32 %v127_v22, %v274_v27  ;;  %v179_v41 = vld [vmem:[%s1175_s2 + $0x78] sm:$0xff]  ;;  %v324_v42 = vmax.f32 %v128_v28, %v275_v32  ;;  %v130_v43 = vmax.f32 %v32_v39, %v81_v40  ;;  %v325_v47 = vmax.f32 %v129_v37, %v276_v38  ;;  %v180_v50 = vld [vmem:[%s1175_s2 + $0x80] sm:$0xff]  ;;  %v83_v54 = vld [vmem:[%s1174_s1 + $0x88] sm:$0xff] }
  0x19   :  { %v228_v44 = vld [vmem:[%s1176_s3 + $0x78] sm:$0xff]  ;;  %v131_v49 = vmax.f32 %v33_v45, %v82_v46  ;;  %v229_v51 = vld [vmem:[%s1176_s3 + $0x80] sm:$0xff]  ;;  %v181_v55 = vld [vmem:[%s1175_s2 + $0x88] sm:$0xff]  ;;  %v132_v58 = vmax.f32 %v34_v52, %v83_v54 }
  0x1a   :  { %372 = vst [vmem:[%s1177_s4 + $0x60] sm:$0xff] %v323_v36  ;;  %v277_v48 = vmax.f32 %v179_v41, %v228_v44  ;;  %373 = vst [vmem:[%s1177_s4 + $0x68] sm:$0xff] %v324_v42  ;;  %v278_v53 = vmax.f32 %v180_v50, %v229_v51  ;;  %v230_v56 = vld [vmem:[%s1176_s3 + $0x88] sm:$0xff]  ;;  %v35_v60 = vld [vmem:[%s1173_s0 + $0x90] sm:$0xff] }
  0x1b   :  { %374 = vst [vmem:[%s1177_s4 + $0x70] sm:$0xff] %v325_v47  ;;  %v279_v59 = vmax.f32 %v181_v55, %v230_v56  ;;  %v84_v61 = vld [vmem:[%s1174_s1 + $0x90] sm:$0xff]  ;;  %v36_v2 = vld [vmem:[%s1173_s0 + $0x98] sm:$0xff]  ;;  %v37_v9 = vld [vmem:[%s1173_s0 + $0xa0] sm:$0xff] }
  0x1c   :  { %v326_v57 = vmax.f32 %v130_v43, %v277_v48  ;;  %v182_v62 = vld [vmem:[%s1175_s2 + $0x90] sm:$0xff]  ;;  %v327_v63 = vmax.f32 %v131_v49, %v278_v53  ;;  %v133_v0 = vmax.f32 %v35_v60, %v84_v61  ;;  %v85_v3 = vld [vmem:[%s1174_s1 + $0x98] sm:$0xff]  ;;  %v86_v11 = vld [vmem:[%s1174_s1 + $0xa0] sm:$0xff] }
  0x1d   :  { %v231_v1 = vld [vmem:[%s1176_s3 + $0x90] sm:$0xff]  ;;  %v328_v4 = vmax.f32 %v132_v58, %v279_v59  ;;  %v134_v6 = vmax.f32 %v36_v2, %v85_v3  ;;  %v183_v7 = vld [vmem:[%s1175_s2 + $0x98] sm:$0xff]  ;;  %v184_v12 = vld [vmem:[%s1175_s2 + $0xa0] sm:$0xff]  ;;  %v135_v15 = vmax.f32 %v37_v9, %v86_v11 }
  0x1e   :  { %375 = vst [vmem:[%s1177_s4 + $0x78] sm:$0xff] %v326_v57  ;;  %v280_v5 = vmax.f32 %v182_v62, %v231_v1  ;;  %v232_v8 = vld [vmem:[%s1176_s3 + $0x98] sm:$0xff]  ;;  %376 = vst [vmem:[%s1177_s4 + $0x80] sm:$0xff] %v327_v63  ;;  %v233_v13 = vld [vmem:[%s1176_s3 + $0xa0] sm:$0xff] }
  0x1f   :  { %v281_v10 = vmax.f32 %v183_v7, %v232_v8  ;;  %377 = vst [vmem:[%s1177_s4 + $0x88] sm:$0xff] %v328_v4  ;;  %v282_v16 = vmax.f32 %v184_v12, %v233_v13  ;;  %v38_v17 = vld [vmem:[%s1173_s0 + $0xa8] sm:$0xff]  ;;  %v39_v23 = vld [vmem:[%s1173_s0 + $0xb0] sm:$0xff]  ;;  %v40_v30 = vld [vmem:[%s1173_s0 + $0xb8] sm:$0xff] }
  0x20   :  { %v329_v14 = vmax.f32 %v133_v0, %v280_v5  ;;  %v87_v18 = vld [vmem:[%s1174_s1 + $0xa8] sm:$0xff]  ;;  %v88_v24 = vld [vmem:[%s1174_s1 + $0xb0] sm:$0xff]  ;;  %v89_v32 = vld [vmem:[%s1174_s1 + $0xb8] sm:$0xff] }
  0x21   :  { %v185_v19 = vld [vmem:[%s1175_s2 + $0xa8] sm:$0xff]  ;;  %v330_v20 = vmax.f32 %v134_v6, %v281_v10  ;;  %v136_v21 = vmax.f32 %v38_v17, %v87_v18  ;;  %v331_v25 = vmax.f32 %v135_v15, %v282_v16  ;;  %v137_v27 = vmax.f32 %v39_v23, %v88_v24  ;;  %v186_v28 = vld [vmem:[%s1175_s2 + $0xb0] sm:$0xff]  ;;  %v187_v33 = vld [vmem:[%s1175_s2 + $0xb8] sm:$0xff] }
  0x22   :  { %v234_v22 = vld [vmem:[%s1176_s3 + $0xa8] sm:$0xff]  ;;  %378 = vst [vmem:[%s1177_s4 + $0x90] sm:$0xff] %v329_v14  ;;  %v235_v29 = vld [vmem:[%s1176_s3 + $0xb0] sm:$0xff]  ;;  %v236_v34 = vld [vmem:[%s1176_s3 + $0xb8] sm:$0xff]  ;;  %v138_v36 = vmax.f32 %v40_v30, %v89_v32 }
  0x23   :  { %v283_v26 = vmax.f32 %v185_v19, %v234_v22  ;;  %379 = vst [vmem:[%s1177_s4 + $0x98] sm:$0xff] %v330_v20  ;;  %v284_v31 = vmax.f32 %v186_v28, %v235_v29  ;;  %380 = vst [vmem:[%s1177_s4 + $0xa0] sm:$0xff] %v331_v25  ;;  %v285_v37 = vmax.f32 %v187_v33, %v236_v34  ;;  %v41_v38 = vld [vmem:[%s1173_s0 + $0xc0] sm:$0xff]  ;;  %v42_v44 = vld [vmem:[%s1173_s0 + $0xc8] sm:$0xff] }
  0x24   :  { %v90_v39 = vld [vmem:[%s1174_s1 + $0xc0] sm:$0xff]  ;;  %v91_v45 = vld [vmem:[%s1174_s1 + $0xc8] sm:$0xff]  ;;  %v43_v51 = vld [vmem:[%s1173_s0 + $0xd0] sm:$0xff] }
  0x25   :  { %v332_v35 = vmax.f32 %v136_v21, %v283_v26  ;;  %v188_v40 = vld [vmem:[%s1175_s2 + $0xc0] sm:$0xff]  ;;  %v333_v41 = vmax.f32 %v137_v27, %v284_v31  ;;  %v139_v42 = vmax.f32 %v41_v38, %v90_v39  ;;  %v334_v46 = vmax.f32 %v138_v36, %v285_v37  ;;  %v189_v49 = vld [vmem:[%s1175_s2 + $0xc8] sm:$0xff]  ;;  %v92_v53 = vld [vmem:[%s1174_s1 + $0xd0] sm:$0xff] }
  0x26   :  { %v237_v43 = vld [vmem:[%s1176_s3 + $0xc0] sm:$0xff]  ;;  %v140_v48 = vmax.f32 %v42_v44, %v91_v45  ;;  %v238_v50 = vld [vmem:[%s1176_s3 + $0xc8] sm:$0xff]  ;;  %v190_v54 = vld [vmem:[%s1175_s2 + $0xd0] sm:$0xff]  ;;  %v141_v57 = vmax.f32 %v43_v51, %v92_v53 }
  0x27   :  { %381 = vst [vmem:[%s1177_s4 + $0xa8] sm:$0xff] %v332_v35  ;;  %v286_v47 = vmax.f32 %v188_v40, %v237_v43  ;;  %382 = vst [vmem:[%s1177_s4 + $0xb0] sm:$0xff] %v333_v41  ;;  %v287_v52 = vmax.f32 %v189_v49, %v238_v50  ;;  %v239_v55 = vld [vmem:[%s1176_s3 + $0xd0] sm:$0xff]  ;;  %v44_v59 = vld [vmem:[%s1173_s0 + $0xd8] sm:$0xff] }
  0x28   :  { %383 = vst [vmem:[%s1177_s4 + $0xb8] sm:$0xff] %v334_v46  ;;  %v288_v58 = vmax.f32 %v190_v54, %v239_v55  ;;  %v93_v60 = vld [vmem:[%s1174_s1 + $0xd8] sm:$0xff]  ;;  %v45_v1 = vld [vmem:[%s1173_s0 + $0xe0] sm:$0xff]  ;;  %v46_v8 = vld [vmem:[%s1173_s0 + $0xe8] sm:$0xff] }
  0x29   :  { %v335_v56 = vmax.f32 %v139_v42, %v286_v47  ;;  %v191_v61 = vld [vmem:[%s1175_s2 + $0xd8] sm:$0xff]  ;;  %v336_v62 = vmax.f32 %v140_v48, %v287_v52  ;;  %v142_v63 = vmax.f32 %v44_v59, %v93_v60  ;;  %v94_v2 = vld [vmem:[%s1174_s1 + $0xe0] sm:$0xff]  ;;  %v95_v10 = vld [vmem:[%s1174_s1 + $0xe8] sm:$0xff] }
  0x2a   :  { %v240_v0 = vld [vmem:[%s1176_s3 + $0xd8] sm:$0xff]  ;;  %v337_v3 = vmax.f32 %v141_v57, %v288_v58  ;;  %v143_v5 = vmax.f32 %v45_v1, %v94_v2  ;;  %v192_v6 = vld [vmem:[%s1175_s2 + $0xe0] sm:$0xff]  ;;  %v193_v11 = vld [vmem:[%s1175_s2 + $0xe8] sm:$0xff]  ;;  %v144_v14 = vmax.f32 %v46_v8, %v95_v10 }
  0x2b   :  { %384 = vst [vmem:[%s1177_s4 + $0xc0] sm:$0xff] %v335_v56  ;;  %v289_v4 = vmax.f32 %v191_v61, %v240_v0  ;;  %v241_v7 = vld [vmem:[%s1176_s3 + $0xe0] sm:$0xff]  ;;  %385 = vst [vmem:[%s1177_s4 + $0xc8] sm:$0xff] %v336_v62  ;;  %v242_v12 = vld [vmem:[%s1176_s3 + $0xe8] sm:$0xff] }
  0x2c   :  { %v290_v9 = vmax.f32 %v192_v6, %v241_v7  ;;  %386 = vst [vmem:[%s1177_s4 + $0xd0] sm:$0xff] %v337_v3  ;;  %v291_v15 = vmax.f32 %v193_v11, %v242_v12  ;;  %v47_v16 = vld [vmem:[%s1173_s0 + $0xf0] sm:$0xff]  ;;  %v48_v22 = vld [vmem:[%s1173_s0 + $0xf8] sm:$0xff]  ;;  %v49_v29 = vld [vmem:[%s1173_s0 + $0x100] sm:$0xff] }
  0x2d   :  { %v338_v13 = vmax.f32 %v142_v63, %v289_v4  ;;  %v96_v17 = vld [vmem:[%s1174_s1 + $0xf0] sm:$0xff]  ;;  %v97_v23 = vld [vmem:[%s1174_s1 + $0xf8] sm:$0xff]  ;;  %v98_v31 = vld [vmem:[%s1174_s1 + $0x100] sm:$0xff] }
  0x2e   :  { %v194_v18 = vld [vmem:[%s1175_s2 + $0xf0] sm:$0xff]  ;;  %v339_v19 = vmax.f32 %v143_v5, %v290_v9  ;;  %v145_v20 = vmax.f32 %v47_v16, %v96_v17  ;;  %v340_v24 = vmax.f32 %v144_v14, %v291_v15  ;;  %v146_v26 = vmax.f32 %v48_v22, %v97_v23  ;;  %v195_v27 = vld [vmem:[%s1175_s2 + $0xf8] sm:$0xff]  ;;  %v196_v32 = vld [vmem:[%s1175_s2 + $0x100] sm:$0xff] }
  0x2f   :  { %v243_v21 = vld [vmem:[%s1176_s3 + $0xf0] sm:$0xff]  ;;  %387 = vst [vmem:[%s1177_s4 + $0xd8] sm:$0xff] %v338_v13  ;;  %v244_v28 = vld [vmem:[%s1176_s3 + $0xf8] sm:$0xff]  ;;  %v245_v33 = vld [vmem:[%s1176_s3 + $0x100] sm:$0xff]  ;;  %v147_v35 = vmax.f32 %v49_v29, %v98_v31 }
  0x30   :  { %v292_v25 = vmax.f32 %v194_v18, %v243_v21  ;;  %388 = vst [vmem:[%s1177_s4 + $0xe0] sm:$0xff] %v339_v19  ;;  %v293_v30 = vmax.f32 %v195_v27, %v244_v28  ;;  %389 = vst [vmem:[%s1177_s4 + $0xe8] sm:$0xff] %v340_v24  ;;  %v294_v36 = vmax.f32 %v196_v32, %v245_v33  ;;  %v50_v37 = vld [vmem:[%s1173_s0 + $0x108] sm:$0xff]  ;;  %v51_v43 = vld [vmem:[%s1173_s0 + $0x110] sm:$0xff] }
  0x31   :  { %v99_v38 = vld [vmem:[%s1174_s1 + $0x108] sm:$0xff]  ;;  %v100_v44 = vld [vmem:[%s1174_s1 + $0x110] sm:$0xff]  ;;  %v52_v50 = vld [vmem:[%s1173_s0 + $0x118] sm:$0xff] }
  0x32   :  { %v341_v34 = vmax.f32 %v145_v20, %v292_v25  ;;  %v197_v39 = vld [vmem:[%s1175_s2 + $0x108] sm:$0xff]  ;;  %v342_v40 = vmax.f32 %v146_v26, %v293_v30  ;;  %v148_v41 = vmax.f32 %v50_v37, %v99_v38  ;;  %v343_v45 = vmax.f32 %v147_v35, %v294_v36  ;;  %v198_v48 = vld [vmem:[%s1175_s2 + $0x110] sm:$0xff]  ;;  %v101_v52 = vld [vmem:[%s1174_s1 + $0x118] sm:$0xff] }
  0x33   :  { %v246_v42 = vld [vmem:[%s1176_s3 + $0x108] sm:$0xff]  ;;  %v149_v47 = vmax.f32 %v51_v43, %v100_v44  ;;  %v247_v49 = vld [vmem:[%s1176_s3 + $0x110] sm:$0xff]  ;;  %v199_v53 = vld [vmem:[%s1175_s2 + $0x118] sm:$0xff]  ;;  %v150_v56 = vmax.f32 %v52_v50, %v101_v52 }
  0x34   :  { %390 = vst [vmem:[%s1177_s4 + $0xf0] sm:$0xff] %v341_v34  ;;  %v295_v46 = vmax.f32 %v197_v39, %v246_v42  ;;  %391 = vst [vmem:[%s1177_s4 + $0xf8] sm:$0xff] %v342_v40  ;;  %v296_v51 = vmax.f32 %v198_v48, %v247_v49  ;;  %v248_v54 = vld [vmem:[%s1176_s3 + $0x118] sm:$0xff]  ;;  %v53_v58 = vld [vmem:[%s1173_s0 + $0x120] sm:$0xff] }
  0x35   :  { %392 = vst [vmem:[%s1177_s4 + $0x100] sm:$0xff] %v343_v45  ;;  %v297_v57 = vmax.f32 %v199_v53, %v248_v54  ;;  %v102_v59 = vld [vmem:[%s1174_s1 + $0x120] sm:$0xff]  ;;  %v54_v0 = vld [vmem:[%s1173_s0 + $0x128] sm:$0xff]  ;;  %v55_v7 = vld [vmem:[%s1173_s0 + $0x130] sm:$0xff] }
  0x36   :  { %v344_v55 = vmax.f32 %v148_v41, %v295_v46  ;;  %v200_v60 = vld [vmem:[%s1175_s2 + $0x120] sm:$0xff]  ;;  %v345_v61 = vmax.f32 %v149_v47, %v296_v51  ;;  %v151_v62 = vmax.f32 %v53_v58, %v102_v59  ;;  %v103_v1 = vld [vmem:[%s1174_s1 + $0x128] sm:$0xff]  ;;  %v104_v9 = vld [vmem:[%s1174_s1 + $0x130] sm:$0xff] }
  0x37   :  { %v249_v63 = vld [vmem:[%s1176_s3 + $0x120] sm:$0xff]  ;;  %v346_v2 = vmax.f32 %v150_v56, %v297_v57  ;;  %v152_v4 = vmax.f32 %v54_v0, %v103_v1  ;;  %v201_v5 = vld [vmem:[%s1175_s2 + $0x128] sm:$0xff]  ;;  %v202_v10 = vld [vmem:[%s1175_s2 + $0x130] sm:$0xff]  ;;  %v153_v13 = vmax.f32 %v55_v7, %v104_v9 }
  0x38   :  { %393 = vst [vmem:[%s1177_s4 + $0x108] sm:$0xff] %v344_v55  ;;  %v298_v3 = vmax.f32 %v200_v60, %v249_v63  ;;  %v250_v6 = vld [vmem:[%s1176_s3 + $0x128] sm:$0xff]  ;;  %394 = vst [vmem:[%s1177_s4 + $0x110] sm:$0xff] %v345_v61  ;;  %v251_v11 = vld [vmem:[%s1176_s3 + $0x130] sm:$0xff] }
  0x39   :  { %v299_v8 = vmax.f32 %v201_v5, %v250_v6  ;;  %395 = vst [vmem:[%s1177_s4 + $0x118] sm:$0xff] %v346_v2  ;;  %v300_v14 = vmax.f32 %v202_v10, %v251_v11  ;;  %v56_v15 = vld [vmem:[%s1173_s0 + $0x138] sm:$0xff]  ;;  %v57_v21 = vld [vmem:[%s1173_s0 + $0x140] sm:$0xff]  ;;  %v58_v28 = vld [vmem:[%s1173_s0 + $0x148] sm:$0xff] }
  0x3a   :  { %v347_v12 = vmax.f32 %v151_v62, %v298_v3  ;;  %v105_v16 = vld [vmem:[%s1174_s1 + $0x138] sm:$0xff]  ;;  %v106_v22 = vld [vmem:[%s1174_s1 + $0x140] sm:$0xff]  ;;  %v107_v30 = vld [vmem:[%s1174_s1 + $0x148] sm:$0xff] }
  0x3b   :  { %v203_v17 = vld [vmem:[%s1175_s2 + $0x138] sm:$0xff]  ;;  %v348_v18 = vmax.f32 %v152_v4, %v299_v8  ;;  %v154_v19 = vmax.f32 %v56_v15, %v105_v16  ;;  %v349_v23 = vmax.f32 %v153_v13, %v300_v14  ;;  %v155_v25 = vmax.f32 %v57_v21, %v106_v22  ;;  %v204_v26 = vld [vmem:[%s1175_s2 + $0x140] sm:$0xff]  ;;  %v205_v31 = vld [vmem:[%s1175_s2 + $0x148] sm:$0xff] }
  0x3c   :  { %v252_v20 = vld [vmem:[%s1176_s3 + $0x138] sm:$0xff]  ;;  %396 = vst [vmem:[%s1177_s4 + $0x120] sm:$0xff] %v347_v12  ;;  %v253_v27 = vld [vmem:[%s1176_s3 + $0x140] sm:$0xff]  ;;  %v254_v32 = vld [vmem:[%s1176_s3 + $0x148] sm:$0xff]  ;;  %v156_v34 = vmax.f32 %v58_v28, %v107_v30 }
  0x3d   :  { %v301_v24 = vmax.f32 %v203_v17, %v252_v20  ;;  %397 = vst [vmem:[%s1177_s4 + $0x128] sm:$0xff] %v348_v18  ;;  %v302_v29 = vmax.f32 %v204_v26, %v253_v27  ;;  %398 = vst [vmem:[%s1177_s4 + $0x130] sm:$0xff] %v349_v23  ;;  %v303_v35 = vmax.f32 %v205_v31, %v254_v32  ;;  %v59_v36 = vld [vmem:[%s1173_s0 + $0x150] sm:$0xff]  ;;  %v60_v42 = vld [vmem:[%s1173_s0 + $0x158] sm:$0xff] }
  0x3e   :  { %v108_v37 = vld [vmem:[%s1174_s1 + $0x150] sm:$0xff]  ;;  %v109_v43 = vld [vmem:[%s1174_s1 + $0x158] sm:$0xff]  ;;  %v61_v49 = vld [vmem:[%s1173_s0 + $0x160] sm:$0xff] }
  0x3f   :  { %v350_v33 = vmax.f32 %v154_v19, %v301_v24  ;;  %v206_v38 = vld [vmem:[%s1175_s2 + $0x150] sm:$0xff]  ;;  %v351_v39 = vmax.f32 %v155_v25, %v302_v29  ;;  %v157_v40 = vmax.f32 %v59_v36, %v108_v37  ;;  %v352_v44 = vmax.f32 %v156_v34, %v303_v35  ;;  %v207_v47 = vld [vmem:[%s1175_s2 + $0x158] sm:$0xff]  ;;  %v110_v51 = vld [vmem:[%s1174_s1 + $0x160] sm:$0xff] }
  0x40   :  { %v255_v41 = vld [vmem:[%s1176_s3 + $0x150] sm:$0xff]  ;;  %v158_v46 = vmax.f32 %v60_v42, %v109_v43  ;;  %v256_v48 = vld [vmem:[%s1176_s3 + $0x158] sm:$0xff]  ;;  %v208_v52 = vld [vmem:[%s1175_s2 + $0x160] sm:$0xff]  ;;  %v159_v55 = vmax.f32 %v61_v49, %v110_v51 }
  0x41   :  { %399 = vst [vmem:[%s1177_s4 + $0x138] sm:$0xff] %v350_v33  ;;  %v304_v45 = vmax.f32 %v206_v38, %v255_v41  ;;  %400 = vst [vmem:[%s1177_s4 + $0x140] sm:$0xff] %v351_v39  ;;  %v305_v50 = vmax.f32 %v207_v47, %v256_v48  ;;  %v257_v53 = vld [vmem:[%s1176_s3 + $0x160] sm:$0xff]  ;;  %v62_v57 = vld [vmem:[%s1173_s0 + $0x168] sm:$0xff] }
  0x42   :  { %401 = vst [vmem:[%s1177_s4 + $0x148] sm:$0xff] %v352_v44  ;;  %v306_v56 = vmax.f32 %v208_v52, %v257_v53  ;;  %v111_v58 = vld [vmem:[%s1174_s1 + $0x168] sm:$0xff]  ;;  %v63_v63 = vld [vmem:[%s1173_s0 + $0x170] sm:$0xff]  ;;  %v64_v6 = vld [vmem:[%s1173_s0 + $0x178] sm:$0xff] }
  0x43   :  { %v353_v54 = vmax.f32 %v157_v40, %v304_v45  ;;  %v209_v59 = vld [vmem:[%s1175_s2 + $0x168] sm:$0xff]  ;;  %v354_v60 = vmax.f32 %v158_v46, %v305_v50  ;;  %v160_v61 = vmax.f32 %v62_v57, %v111_v58  ;;  %v112_v0 = vld [vmem:[%s1174_s1 + $0x170] sm:$0xff]  ;;  %v113_v8 = vld [vmem:[%s1174_s1 + $0x178] sm:$0xff] }
  0x44   :  { %v258_v62 = vld [vmem:[%s1176_s3 + $0x168] sm:$0xff]  ;;  %v355_v1 = vmax.f32 %v159_v55, %v306_v56  ;;  %v161_v3 = vmax.f32 %v63_v63, %v112_v0  ;;  %v210_v4 = vld [vmem:[%s1175_s2 + $0x170] sm:$0xff]  ;;  %v211_v9 = vld [vmem:[%s1175_s2 + $0x178] sm:$0xff]  ;;  %v162_v12 = vmax.f32 %v64_v6, %v113_v8 }
  0x45   :  { %402 = vst [vmem:[%s1177_s4 + $0x150] sm:$0xff] %v353_v54  ;;  %v307_v2 = vmax.f32 %v209_v59, %v258_v62  ;;  %v259_v5 = vld [vmem:[%s1176_s3 + $0x170] sm:$0xff]  ;;  %403 = vst [vmem:[%s1177_s4 + $0x158] sm:$0xff] %v354_v60  ;;  %v260_v10 = vld [vmem:[%s1176_s3 + $0x178] sm:$0xff] }
  0x46   :  { %v308_v7 = vmax.f32 %v210_v4, %v259_v5  ;;  %404 = vst [vmem:[%s1177_s4 + $0x160] sm:$0xff] %v355_v1  ;;  %v309_v13 = vmax.f32 %v211_v9, %v260_v10  ;;  %v65_v14 = vld [vmem:[%s1173_s0 + $0x180] sm:$0xff] }
  0x47   :  { %v356_v11 = vmax.f32 %v160_v61, %v307_v2  ;;  %v114_v15 = vld [vmem:[%s1174_s1 + $0x180] sm:$0xff] }
  0x48   :  { %v212_v16 = vld [vmem:[%s1175_s2 + $0x180] sm:$0xff]  ;;  %v357_v17 = vmax.f32 %v161_v3, %v308_v7  ;;  %v163_v18 = vmax.f32 %v65_v14, %v114_v15  ;;  %v358_v20 = vmax.f32 %v162_v12, %v309_v13 }
  0x49   :  { %v261_v19 = vld [vmem:[%s1176_s3 + $0x180] sm:$0xff]  ;;  %405 = vst [vmem:[%s1177_s4 + $0x168] sm:$0xff] %v356_v11 }
  0x4a   :  { %v310_v21 = vmax.f32 %v212_v16, %v261_v19  ;;  %406 = vst [vmem:[%s1177_s4 + $0x170] sm:$0xff] %v357_v17  ;;  %407 = vst [vmem:[%s1177_s4 + $0x178] sm:$0xff] %v358_v20 }
  0x4c   :  { %v359_v22 = vmax.f32 %v163_v18, %v310_v21 }
  0x4e   :  { %408 = vst [vmem:[%s1177_s4 + $0x180] sm:$0xff] %v359_v22 }

// kernel: lenet_forward.7
= control target key start
LH: loop header
LB: loop body
LE: loop exit
PB: predicated region body
PF: predicated region fallthrough
CT: control target
= control target key end

     0   :  { %v767_v0 = vmov 0.0|0.0   ;;  %s1417_s1 = inlined_call_operand.vmem [shape: f32[512,128], index: 1, kind: input, shape index: {}]   ;;  %s1418_s0 = inlined_call_operand.vmem [shape: f32[200,512], index: 0, kind: input, shape index: {}]   ;;  %s1419_s2 = inlined_call_operand.vmem [shape: f32[1,128], index: 2, kind: input, shape index: {}]   ;;  %s1420_s3 = inlined_call_operand.vmem [shape: f32[200,128], index: 3, kind: output, shape index: {}]  }
   0x1   :  { %620 = vmatprep.subr.bf16.mxu1 %v767_v0  ;;  %v114_v1 = vld [vmem:[%s1417_s1] sm:$0xff]  ;;  %v115_v2 = vld [vmem:[%s1417_s1 + $0x8] sm:$0xff]  ;;  %668 = vmatprep.subr.bf16.mxu0 %v767_v0  ;;  %v116_v6 = vld [vmem:[%s1417_s1 + $0x10] sm:$0xff] }
   0x2   :  { %v146_v3 = vld [vmem:[%s1417_s1 + $0x100] sm:$0xff]  ;;  %v621_v4 = vpack.c.bf16 %v115_v2, %v114_v1  ;;  %v147_v5 = vld [vmem:[%s1417_s1 + $0x108] sm:$0xff]  ;;  %v117_v7 = vld [vmem:[%s1417_s1 + $0x18] sm:$0xff] }
   0x3   :  { %v669_v8 = vpack.c.bf16 %v147_v5, %v146_v3  ;;  %v148_v9 = vld [vmem:[%s1417_s1 + $0x110] sm:$0xff]  ;;  %v149_v10 = vld [vmem:[%s1417_s1 + $0x118] sm:$0xff]  ;;  %v624_v11 = vpack.c.bf16 %v117_v7, %v116_v6  ;;  %v118_v13 = vld [vmem:[%s1417_s1 + $0x20] sm:$0xff] }
   0x4   :  { %622 = vmatpush1.bf16.msra.mxu1 %v621_v4  ;;  %v672_v12 = vpack.c.bf16 %v149_v10, %v148_v9  ;;  %v119_v14 = vld [vmem:[%s1417_s1 + $0x28] sm:$0xff]  ;;  %v150_v15 = vld [vmem:[%s1417_s1 + $0x120] sm:$0xff]  ;;  %v120_v19 = vld [vmem:[%s1417_s1 + $0x30] sm:$0xff] }
   0x5   :  { %670 = vmatpush1.bf16.msra.mxu0 %v669_v8  ;;  %623 = vmatprep.subr.bf16.mxu1 %v767_v0  ;;  %v151_v16 = vld [vmem:[%s1417_s1 + $0x128] sm:$0xff]  ;;  %v627_v17 = vpack.c.bf16 %v119_v14, %v118_v13  ;;  %v121_v20 = vld [vmem:[%s1417_s1 + $0x38] sm:$0xff]  ;;  %v152_v21 = vld [vmem:[%s1417_s1 + $0x130] sm:$0xff] }
   0x6   :  { %671 = vmatprep.subr.bf16.mxu0 %v767_v0  ;;  %v675_v18 = vpack.c.bf16 %v151_v16, %v150_v15  ;;  %v153_v22 = vld [vmem:[%s1417_s1 + $0x138] sm:$0xff]  ;;  %v630_v23 = vpack.c.bf16 %v121_v20, %v120_v19  ;;  %v122_v25 = vld [vmem:[%s1417_s1 + $0x40] sm:$0xff]  ;;  %v123_v26 = vld [vmem:[%s1417_s1 + $0x48] sm:$0xff] }
   0x7   :  { %v678_v24 = vpack.c.bf16 %v153_v22, %v152_v21  ;;  %v154_v27 = vld [vmem:[%s1417_s1 + $0x140] sm:$0xff]  ;;  %v155_v28 = vld [vmem:[%s1417_s1 + $0x148] sm:$0xff]  ;;  %v633_v29 = vpack.c.bf16 %v123_v26, %v122_v25  ;;  %v124_v31 = vld [vmem:[%s1417_s1 + $0x50] sm:$0xff] }
   0x8   :  { %625 = vmatpush1.bf16.msra.mxu1 %v624_v11  ;;  %v681_v30 = vpack.c.bf16 %v155_v28, %v154_v27  ;;  %v125_v32 = vld [vmem:[%s1417_s1 + $0x58] sm:$0xff]  ;;  %v156_v33 = vld [vmem:[%s1417_s1 + $0x150] sm:$0xff]  ;;  %v126_v37 = vld [vmem:[%s1417_s1 + $0x60] sm:$0xff] }
   0x9   :  { %673 = vmatpush1.bf16.msra.mxu0 %v672_v12  ;;  %626 = vmatprep.subr.bf16.mxu1 %v767_v0  ;;  %v157_v34 = vld [vmem:[%s1417_s1 + $0x158] sm:$0xff]  ;;  %v636_v35 = vpack.c.bf16 %v125_v32, %v124_v31  ;;  %v127_v38 = vld [vmem:[%s1417_s1 + $0x68] sm:$0xff]  ;;  %v158_v39 = vld [vmem:[%s1417_s1 + $0x160] sm:$0xff] }
   0xa   :  { %674 = vmatprep.subr.bf16.mxu0 %v767_v0  ;;  %v684_v36 = vpack.c.bf16 %v157_v34, %v156_v33  ;;  %v159_v40 = vld [vmem:[%s1417_s1 + $0x168] sm:$0xff]  ;;  %v17_v42 = vld [vmem:[%s1418_s0 + $0x18] sm:$0xff]  ;;  %v639_v43 = vpack.c.bf16 %v127_v38, %v126_v37  ;;  %v128_v45 = vld [vmem:[%s1417_s1 + $0x70] sm:$0xff] }
   0xb   :  { %v15_v41 = vld [vmem:[%s1418_s0 + $0x8] sm:$0xff]  ;;  %439 = vmatprep.mubr.f32.mxu0 %v17_v42  ;;  %v687_v44 = vpack.c.bf16 %v159_v40, %v158_v39  ;;  %v129_v46 = vld [vmem:[%s1417_s1 + $0x78] sm:$0xff]  ;;  %v160_v47 = vld [vmem:[%s1417_s1 + $0x170] sm:$0xff] }
   0xc   :  { %628 = vmatpush1.bf16.msra.mxu1 %v627_v17  ;;  %249 = vmatprep.mubr.f32.mxu1 %v15_v41  ;;  %v161_v48 = vld [vmem:[%s1417_s1 + $0x178] sm:$0xff]  ;;  %v642_v49 = vpack.c.bf16 %v129_v46, %v128_v45  ;;  %v130_v51 = vld [vmem:[%s1417_s1 + $0x80] sm:$0xff]  ;;  %v131_v52 = vld [vmem:[%s1417_s1 + $0x88] sm:$0xff] }
   0xd   :  { %676 = vmatpush1.bf16.msra.mxu0 %v675_v18  ;;  %629 = vmatprep.subr.bf16.mxu1 %v767_v0  ;;  %v690_v50 = vpack.c.bf16 %v161_v48, %v160_v47  ;;  %v162_v53 = vld [vmem:[%s1417_s1 + $0x180] sm:$0xff]  ;;  %v163_v54 = vld [vmem:[%s1417_s1 + $0x188] sm:$0xff]  ;;  %v645_v55 = vpack.c.bf16 %v131_v52, %v130_v51  ;;  %v132_v57 = vld [vmem:[%s1417_s1 + $0x90] sm:$0xff] }
   0xe   :  { %677 = vmatprep.subr.bf16.mxu0 %v767_v0  ;;  %v693_v56 = vpack.c.bf16 %v163_v54, %v162_v53  ;;  %v133_v58 = vld [vmem:[%s1417_s1 + $0x98] sm:$0xff]  ;;  %v164_v59 = vld [vmem:[%s1417_s1 + $0x190] sm:$0xff]  ;;  %v134_v63 = vld [vmem:[%s1417_s1 + $0xa0] sm:$0xff] }
   0xf   :  { %v165_v60 = vld [vmem:[%s1417_s1 + $0x198] sm:$0xff]  ;;  %v648_v61 = vpack.c.bf16 %v133_v58, %v132_v57  ;;  %v135_v1 = vld [vmem:[%s1417_s1 + $0xa8] sm:$0xff]  ;;  %v166_v2 = vld [vmem:[%s1417_s1 + $0x1a0] sm:$0xff] }
  0x10   :  { %631 = vmatpush1.bf16.msra.mxu1 %v630_v23  ;;  %v696_v62 = vpack.c.bf16 %v165_v60, %v164_v59  ;;  %v167_v3 = vld [vmem:[%s1417_s1 + $0x1a8] sm:$0xff]  ;;  %v651_v4 = vpack.c.bf16 %v135_v1, %v134_v63  ;;  %v136_v6 = vld [vmem:[%s1417_s1 + $0xb0] sm:$0xff]  ;;  %v137_v7 = vld [vmem:[%s1417_s1 + $0xb8] sm:$0xff] }
  0x11   :  { %679 = vmatpush1.bf16.msra.mxu0 %v678_v24  ;;  %632 = vmatprep.subr.bf16.mxu1 %v767_v0  ;;  %v699_v5 = vpack.c.bf16 %v167_v3, %v166_v2  ;;  %v168_v8 = vld [vmem:[%s1417_s1 + $0x1b0] sm:$0xff]  ;;  %v169_v9 = vld [vmem:[%s1417_s1 + $0x1b8] sm:$0xff]  ;;  %v654_v10 = vpack.c.bf16 %v137_v7, %v136_v6  ;;  %v138_v12 = vld [vmem:[%s1417_s1 + $0xc0] sm:$0xff] }
  0x12   :  { %680 = vmatprep.subr.bf16.mxu0 %v767_v0  ;;  %v702_v11 = vpack.c.bf16 %v169_v9, %v168_v8  ;;  %v139_v13 = vld [vmem:[%s1417_s1 + $0xc8] sm:$0xff]  ;;  %v170_v14 = vld [vmem:[%s1417_s1 + $0x1c0] sm:$0xff]  ;;  %v140_v18 = vld [vmem:[%s1417_s1 + $0xd0] sm:$0xff] }
  0x13   :  { %v171_v15 = vld [vmem:[%s1417_s1 + $0x1c8] sm:$0xff]  ;;  %v657_v16 = vpack.c.bf16 %v139_v13, %v138_v12  ;;  %v141_v19 = vld [vmem:[%s1417_s1 + $0xd8] sm:$0xff]  ;;  %v172_v20 = vld [vmem:[%s1417_s1 + $0x1d0] sm:$0xff] }
  0x14   :  { %634 = vmatpush1.bf16.msra.mxu1 %v633_v29  ;;  %v705_v17 = vpack.c.bf16 %v171_v15, %v170_v14  ;;  %v173_v21 = vld [vmem:[%s1417_s1 + $0x1d8] sm:$0xff]  ;;  %v660_v22 = vpack.c.bf16 %v141_v19, %v140_v18  ;;  %v142_v24 = vld [vmem:[%s1417_s1 + $0xe0] sm:$0xff]  ;;  %v143_v25 = vld [vmem:[%s1417_s1 + $0xe8] sm:$0xff] }
  0x15   :  { %682 = vmatpush1.bf16.msra.mxu0 %v681_v30  ;;  %635 = vmatprep.subr.bf16.mxu1 %v767_v0  ;;  %v708_v23 = vpack.c.bf16 %v173_v21, %v172_v20  ;;  %v174_v26 = vld [vmem:[%s1417_s1 + $0x1e0] sm:$0xff]  ;;  %v175_v27 = vld [vmem:[%s1417_s1 + $0x1e8] sm:$0xff]  ;;  %v663_v28 = vpack.c.bf16 %v143_v25, %v142_v24  ;;  %v144_v30 = vld [vmem:[%s1417_s1 + $0xf0] sm:$0xff] }
  0x16   :  { %683 = vmatprep.subr.bf16.mxu0 %v767_v0  ;;  %v711_v29 = vpack.c.bf16 %v175_v27, %v174_v26  ;;  %v145_v31 = vld [vmem:[%s1417_s1 + $0xf8] sm:$0xff]  ;;  %v176_v32 = vld [vmem:[%s1417_s1 + $0x1f0] sm:$0xff]  ;;  %v19_v38 = vld [vmem:[%s1418_s0 + $0x28] sm:$0xff] }
  0x17   :  { %v177_v33 = vld [vmem:[%s1417_s1 + $0x1f8] sm:$0xff]  ;;  %v666_v34 = vpack.c.bf16 %v145_v31, %v144_v30  ;;  %v16_v37 = vld [vmem:[%s1418_s0 + $0x10] sm:$0xff]  ;;  %v23_v41 = vld [vmem:[%s1418_s0 + $0x48] sm:$0xff] }
  0x18   :  { %637 = vmatpush1.bf16.msra.mxu1 %v636_v35  ;;  %v714_v35 = vpack.c.bf16 %v177_v33, %v176_v32  ;;  %v21_v39 = vld [vmem:[%s1418_s0 + $0x38] sm:$0xff]  ;;  %v20_v40 = vld [vmem:[%s1418_s0 + $0x30] sm:$0xff]  ;;  %v27_v45 = vld [vmem:[%s1418_s0 + $0x68] sm:$0xff] }
  0x19   :  { %685 = vmatpush1.bf16.msra.mxu0 %v684_v36  ;;  %638 = vmatprep.subr.bf16.mxu1 %v767_v0  ;;  %v14_v36 = vld [vmem:[%s1418_s0] sm:$0xff]  ;;  %v25_v42 = vld [vmem:[%s1418_s0 + $0x58] sm:$0xff]  ;;  %v28_v48 = vld [vmem:[%s1418_s0 + $0x70] sm:$0xff] }
  0x1a   :  { %686 = vmatprep.subr.bf16.mxu0 %v767_v0  ;;  %v29_v46 = vld [vmem:[%s1418_s0 + $0x78] sm:$0xff]  ;;  %v26_v47 = vld [vmem:[%s1418_s0 + $0x60] sm:$0xff]  ;;  %v32_v52 = vld [vmem:[%s1418_s0 + $0x90] sm:$0xff] }
  0x1b   :  { %v30_v51 = vld [vmem:[%s1418_s0 + $0x80] sm:$0xff]  ;;  %v35_v53 = vld [vmem:[%s1418_s0 + $0xa8] sm:$0xff]  ;;  %v37_v54 = vld [vmem:[%s1418_s0 + $0xb8] sm:$0xff] }
  0x1c   :  { %640 = vmatpush1.bf16.msra.mxu1 %v639_v43  ;;  %v22_v43 = vld [vmem:[%s1418_s0 + $0x40] sm:$0xff]  ;;  %v39_v57 = vld [vmem:[%s1418_s0 + $0xc8] sm:$0xff]  ;;  %v41_v58 = vld [vmem:[%s1418_s0 + $0xd8] sm:$0xff] }
  0x1d   :  { %688 = vmatpush1.bf16.msra.mxu0 %v687_v44  ;;  %641 = vmatprep.subr.bf16.mxu1 %v767_v0  ;;  %v24_v44 = vld [vmem:[%s1418_s0 + $0x50] sm:$0xff]  ;;  %v38_v59 = vld [vmem:[%s1418_s0 + $0xc0] sm:$0xff]  ;;  %v47_v2 = vld [vmem:[%s1418_s0 + $0x108] sm:$0xff] }
  0x1e   :  { %689 = vmatprep.subr.bf16.mxu0 %v767_v0  ;;  %v40_v60 = vld [vmem:[%s1418_s0 + $0xd0] sm:$0xff]  ;;  %v42_v63 = vld [vmem:[%s1418_s0 + $0xe0] sm:$0xff]  ;;  %v49_v3 = vld [vmem:[%s1418_s0 + $0x118] sm:$0xff] }
  0x1f   :  { %v44_v1 = vld [vmem:[%s1418_s0 + $0xf0] sm:$0xff]  ;;  %v51_v6 = vld [vmem:[%s1418_s0 + $0x128] sm:$0xff]  ;;  %v53_v7 = vld [vmem:[%s1418_s0 + $0x138] sm:$0xff] }
  0x20   :  { %643 = vmatpush1.bf16.msra.mxu1 %v642_v49  ;;  %v31_v49 = vld [vmem:[%s1418_s0 + $0x88] sm:$0xff]  ;;  %v50_v8 = vld [vmem:[%s1418_s0 + $0x120] sm:$0xff]  ;;  %v52_v9 = vld [vmem:[%s1418_s0 + $0x130] sm:$0xff] }
  0x21   :  { %691 = vmatpush1.bf16.msra.mxu0 %v690_v50  ;;  %644 = vmatprep.subr.bf16.mxu1 %v767_v0  ;;  %v33_v50 = vld [vmem:[%s1418_s0 + $0x98] sm:$0xff]  ;;  %v54_v12 = vld [vmem:[%s1418_s0 + $0x140] sm:$0xff]  ;;  %v56_v13 = vld [vmem:[%s1418_s0 + $0x150] sm:$0xff] }
  0x22   :  { %692 = vmatprep.subr.bf16.mxu0 %v767_v0  ;;  %v59_v14 = vld [vmem:[%s1418_s0 + $0x168] sm:$0xff]  ;;  %v61_v15 = vld [vmem:[%s1418_s0 + $0x178] sm:$0xff]  ;;  %v62_v20 = vld [vmem:[%s1418_s0 + $0x180] sm:$0xff] }
  0x23   :  { %v63_v18 = vld [vmem:[%s1418_s0 + $0x188] sm:$0xff]  ;;  %v65_v19 = vld [vmem:[%s1418_s0 + $0x198] sm:$0xff]  ;;  %v64_v21 = vld [vmem:[%s1418_s0 + $0x190] sm:$0xff] }
  0x24   :  { %646 = vmatpush1.bf16.msra.mxu1 %v645_v55  ;;  %v34_v55 = vld [vmem:[%s1418_s0 + $0xa0] sm:$0xff]  ;;  %v68_v25 = vld [vmem:[%s1418_s0 + $0x1b0] sm:$0xff]  ;;  %v71_v26 = vld [vmem:[%s1418_s0 + $0x1c8] sm:$0xff] }
  0x25   :  { %694 = vmatpush1.bf16.msra.mxu0 %v693_v56  ;;  %647 = vmatprep.subr.bf16.mxu1 %v767_v0  ;;  %v36_v56 = vld [vmem:[%s1418_s0 + $0xb0] sm:$0xff]  ;;  %v66_v24 = vld [vmem:[%s1418_s0 + $0x1a0] sm:$0xff]  ;;  %v73_v27 = vld [vmem:[%s1418_s0 + $0x1d8] sm:$0xff] }
  0x26   :  { %695 = vmatprep.subr.bf16.mxu0 %v767_v0  ;;  %v75_v30 = vld [vmem:[%s1418_s0 + $0x1e8] sm:$0xff]  ;;  %v77_v31 = vld [vmem:[%s1418_s0 + $0x1f8] sm:$0xff]  ;;  %v74_v32 = vld [vmem:[%s1418_s0 + $0x1e0] sm:$0xff] }
  0x27   :  { %v76_v33 = vld [vmem:[%s1418_s0 + $0x1f0] sm:$0xff] }
  0x28   :  { %649 = vmatpush1.bf16.msra.mxu1 %v648_v61  ;;  %v43_v61 = vld [vmem:[%s1418_s0 + $0xe8] sm:$0xff] }
  0x29   :  { %697 = vmatpush1.bf16.msra.mxu0 %v696_v62  ;;  %650 = vmatprep.subr.bf16.mxu1 %v767_v0  ;;  %v45_v62 = vld [vmem:[%s1418_s0 + $0xf8] sm:$0xff] }
  0x2a   :  { %698 = vmatprep.subr.bf16.mxu0 %v767_v0 }
  0x2c   :  { %652 = vmatpush1.bf16.msra.mxu1 %v651_v4  ;;  %v46_v4 = vld [vmem:[%s1418_s0 + $0x100] sm:$0xff] }
  0x2d   :  { %700 = vmatpush1.bf16.msra.mxu0 %v699_v5  ;;  %653 = vmatprep.subr.bf16.mxu1 %v767_v0  ;;  %v48_v5 = vld [vmem:[%s1418_s0 + $0x110] sm:$0xff] }
  0x2e   :  { %701 = vmatprep.subr.bf16.mxu0 %v767_v0 }
  0x30   :  { %655 = vmatpush1.bf16.msra.mxu1 %v654_v10  ;;  %v55_v10 = vld [vmem:[%s1418_s0 + $0x148] sm:$0xff] }
  0x31   :  { %703 = vmatpush1.bf16.msra.mxu0 %v702_v11  ;;  %656 = vmatprep.subr.bf16.mxu1 %v767_v0  ;;  %v57_v11 = vld [vmem:[%s1418_s0 + $0x158] sm:$0xff] }
  0x32   :  { %704 = vmatprep.subr.bf16.mxu0 %v767_v0 }
  0x34   :  { %658 = vmatpush1.bf16.msra.mxu1 %v657_v16  ;;  %v58_v16 = vld [vmem:[%s1418_s0 + $0x160] sm:$0xff] }
  0x35   :  { %706 = vmatpush1.bf16.msra.mxu0 %v705_v17  ;;  %659 = vmatprep.subr.bf16.mxu1 %v767_v0  ;;  %v60_v17 = vld [vmem:[%s1418_s0 + $0x170] sm:$0xff] }
  0x36   :  { %707 = vmatprep.subr.bf16.mxu0 %v767_v0 }
  0x38   :  { %661 = vmatpush1.bf16.msra.mxu1 %v660_v22  ;;  %v67_v22 = vld [vmem:[%s1418_s0 + $0x1a8] sm:$0xff] }
  0x39   :  { %709 = vmatpush1.bf16.msra.mxu0 %v708_v23  ;;  %662 = vmatprep.subr.bf16.mxu1 %v767_v0  ;;  %v69_v23 = vld [vmem:[%s1418_s0 + $0x1b8] sm:$0xff] }
  0x3a   :  { %710 = vmatprep.subr.bf16.mxu0 %v767_v0 }
  0x3c   :  { %664 = vmatpush1.bf16.msra.mxu1 %v663_v28  ;;  %v70_v28 = vld [vmem:[%s1418_s0 + $0x1c0] sm:$0xff] }
  0x3d   :  { %712 = vmatpush1.bf16.msra.mxu0 %v711_v29  ;;  %665 = vmatprep.subr.bf16.mxu1 %v767_v0  ;;  %v72_v29 = vld [vmem:[%s1418_s0 + $0x1d0] sm:$0xff] }
  0x3e   :  { %713 = vmatprep.subr.bf16.mxu0 %v767_v0  ;;  %v18_v0 = vld [vmem:[%s1418_s0 + $0x20] sm:$0xff] }
  0x40   :  { %667 = vmatpush1.bf16.msra.mxu1 %v666_v34  ;;  %v79_v34 = vld [vmem:[%s1418_s0 + $0x208] sm:$0xff] }
  0x41   :  { %715 = vmatpush1.bf16.msra.mxu0 %v714_v35  ;;  %v81_v35 = vld [vmem:[%s1418_s0 + $0x218] sm:$0xff] }
  0x43   :  { %250 = vmatmul.mubr.f32.vlgmr.msra.gmra.mrb[0].mxu1 %v14_v36  ;;  %v78_v36 = vld [vmem:[%s1418_s0 + $0x200] sm:$0xff] }
  0x44   :  { %440 = vmatmul.mubr.f32.vlgmr.msra.gmra.mrb[0].mxu0 %v16_v37  ;;  %254 = vmatprep.mubr.f32.mxu1 %v19_v38  ;;  %v80_v37 = vld [vmem:[%s1418_s0 + $0x210] sm:$0xff]  ;;  %v83_v38 = vld [vmem:[%s1418_s0 + $0x228] sm:$0xff] }
  0x45   :  { %444 = vmatprep.mubr.f32.mxu0 %v21_v39  ;;  %v85_v39 = vld [vmem:[%s1418_s0 + $0x238] sm:$0xff] }
  0x47   :  { %255 = vmatmul.mubr.f32.gmra.mrb[2].mxu1 %v18_v0  ;;  %v82_v0 = vld [vmem:[%s1418_s0 + $0x220] sm:$0xff] }
  0x48   :  { %445 = vmatmul.mubr.f32.gmra.mrb[2].mxu0 %v20_v40  ;;  %259 = vmatprep.mubr.f32.mxu1 %v23_v41  ;;  %v84_v40 = vld [vmem:[%s1418_s0 + $0x230] sm:$0xff]  ;;  %v87_v41 = vld [vmem:[%s1418_s0 + $0x248] sm:$0xff] }
  0x49   :  { %449 = vmatprep.mubr.f32.mxu0 %v25_v42  ;;  %v89_v42 = vld [vmem:[%s1418_s0 + $0x258] sm:$0xff] }
  0x4b   :  { %260 = vmatmul.mubr.f32.gmra.mrb[4].mxu1 %v22_v43  ;;  %v86_v43 = vld [vmem:[%s1418_s0 + $0x240] sm:$0xff] }
  0x4c   :  { %450 = vmatmul.mubr.f32.gmra.mrb[4].mxu0 %v24_v44  ;;  %264 = vmatprep.mubr.f32.mxu1 %v27_v45  ;;  %v88_v44 = vld [vmem:[%s1418_s0 + $0x250] sm:$0xff]  ;;  %v91_v45 = vld [vmem:[%s1418_s0 + $0x268] sm:$0xff] }
  0x4d   :  { %454 = vmatprep.mubr.f32.mxu0 %v29_v46  ;;  %v93_v46 = vld [vmem:[%s1418_s0 + $0x278] sm:$0xff] }
  0x4f   :  { %265 = vmatmul.mubr.f32.gmra.mrb[6].mxu1 %v26_v47  ;;  %v90_v47 = vld [vmem:[%s1418_s0 + $0x260] sm:$0xff] }
  0x50   :  { %455 = vmatmul.mubr.f32.gmra.mrb[6].mxu0 %v28_v48  ;;  %269 = vmatprep.mubr.f32.mxu1 %v31_v49  ;;  %v92_v48 = vld [vmem:[%s1418_s0 + $0x270] sm:$0xff]  ;;  %v95_v49 = vld [vmem:[%s1418_s0 + $0x288] sm:$0xff] }
  0x51   :  { %459 = vmatprep.mubr.f32.mxu0 %v33_v50  ;;  %v97_v50 = vld [vmem:[%s1418_s0 + $0x298] sm:$0xff] }
  0x53   :  { %270 = vmatmul.mubr.f32.gmra.mrb[8].mxu1 %v30_v51  ;;  %v94_v51 = vld [vmem:[%s1418_s0 + $0x280] sm:$0xff] }
  0x54   :  { %460 = vmatmul.mubr.f32.gmra.mrb[8].mxu0 %v32_v52  ;;  %274 = vmatprep.mubr.f32.mxu1 %v35_v53  ;;  %v96_v52 = vld [vmem:[%s1418_s0 + $0x290] sm:$0xff]  ;;  %v99_v53 = vld [vmem:[%s1418_s0 + $0x2a8] sm:$0xff] }
  0x55   :  { %464 = vmatprep.mubr.f32.mxu0 %v37_v54  ;;  %v101_v54 = vld [vmem:[%s1418_s0 + $0x2b8] sm:$0xff] }
  0x57   :  { %275 = vmatmul.mubr.f32.gmra.mrb[10].mxu1 %v34_v55  ;;  %v98_v55 = vld [vmem:[%s1418_s0 + $0x2a0] sm:$0xff] }
  0x58   :  { %465 = vmatmul.mubr.f32.gmra.mrb[10].mxu0 %v36_v56  ;;  %279 = vmatprep.mubr.f32.mxu1 %v39_v57  ;;  %v100_v56 = vld [vmem:[%s1418_s0 + $0x2b0] sm:$0xff]  ;;  %v103_v57 = vld [vmem:[%s1418_s0 + $0x2c8] sm:$0xff] }
  0x59   :  { %469 = vmatprep.mubr.f32.mxu0 %v41_v58  ;;  %v105_v58 = vld [vmem:[%s1418_s0 + $0x2d8] sm:$0xff] }
  0x5b   :  { %280 = vmatmul.mubr.f32.gmra.mrb[12].mxu1 %v38_v59  ;;  %v102_v59 = vld [vmem:[%s1418_s0 + $0x2c0] sm:$0xff] }
  0x5c   :  { %470 = vmatmul.mubr.f32.gmra.mrb[12].mxu0 %v40_v60  ;;  %284 = vmatprep.mubr.f32.mxu1 %v43_v61  ;;  %v104_v60 = vld [vmem:[%s1418_s0 + $0x2d0] sm:$0xff]  ;;  %v107_v61 = vld [vmem:[%s1418_s0 + $0x2e8] sm:$0xff] }
  0x5d   :  { %474 = vmatprep.mubr.f32.mxu0 %v45_v62  ;;  %v109_v62 = vld [vmem:[%s1418_s0 + $0x2f8] sm:$0xff] }
  0x5f   :  { %285 = vmatmul.mubr.f32.gmra.mrb[14].mxu1 %v42_v63  ;;  %v106_v63 = vld [vmem:[%s1418_s0 + $0x2e0] sm:$0xff] }
  0x60   :  { %475 = vmatmul.mubr.f32.gmra.mrb[14].mxu0 %v44_v1  ;;  %289 = vmatprep.mubr.f32.mxu1 %v47_v2  ;;  %v108_v1 = vld [vmem:[%s1418_s0 + $0x2f0] sm:$0xff]  ;;  %v111_v2 = vld [vmem:[%s1418_s0 + $0x308] sm:$0xff] }
  0x61   :  { %479 = vmatprep.mubr.f32.mxu0 %v49_v3  ;;  %v113_v3 = vld [vmem:[%s1418_s0 + $0x318] sm:$0xff] }
  0x63   :  { %290 = vmatmul.mubr.f32.gmra.mrb[16].mxu1 %v46_v4  ;;  %v110_v4 = vld [vmem:[%s1418_s0 + $0x300] sm:$0xff] }
  0x64   :  { %480 = vmatmul.mubr.f32.gmra.mrb[16].mxu0 %v48_v5  ;;  %294 = vmatprep.mubr.f32.mxu1 %v51_v6  ;;  %v112_v5 = vld [vmem:[%s1418_s0 + $0x310] sm:$0xff]  ;;  %v1315_v6 = vld [vmem:[%s1419_s2] ss:$0 sm:$0xff] }
  0x65   :  { %484 = vmatprep.mubr.f32.mxu0 %v53_v7 }
  0x67   :  { %295 = vmatmul.mubr.f32.gmra.mrb[18].mxu1 %v50_v8 }
  0x68   :  { %485 = vmatmul.mubr.f32.gmra.mrb[18].mxu0 %v52_v9  ;;  %299 = vmatprep.mubr.f32.mxu1 %v55_v10 }
  0x69   :  { %489 = vmatprep.mubr.f32.mxu0 %v57_v11 }
  0x6b   :  { %300 = vmatmul.mubr.f32.gmra.mrb[20].mxu1 %v54_v12 }
  0x6c   :  { %490 = vmatmul.mubr.f32.gmra.mrb[20].mxu0 %v56_v13  ;;  %304 = vmatprep.mubr.f32.mxu1 %v59_v14 }
  0x6d   :  { %494 = vmatprep.mubr.f32.mxu0 %v61_v15 }
  0x6f   :  { %305 = vmatmul.mubr.f32.gmra.mrb[22].mxu1 %v58_v16 }
  0x70   :  { %495 = vmatmul.mubr.f32.gmra.mrb[22].mxu0 %v60_v17  ;;  %309 = vmatprep.mubr.f32.mxu1 %v63_v18 }
  0x71   :  { %499 = vmatprep.mubr.f32.mxu0 %v65_v19 }
  0x73   :  { %310 = vmatmul.mubr.f32.gmra.mrb[24].mxu1 %v62_v20 }
  0x74   :  { %500 = vmatmul.mubr.f32.gmra.mrb[24].mxu0 %v64_v21  ;;  %314 = vmatprep.mubr.f32.mxu1 %v67_v22 }
  0x75   :  { %504 = vmatprep.mubr.f32.mxu0 %v69_v23 }
  0x77   :  { %315 = vmatmul.mubr.f32.gmra.mrb[26].mxu1 %v66_v24 }
  0x78   :  { %505 = vmatmul.mubr.f32.gmra.mrb[26].mxu0 %v68_v25  ;;  %319 = vmatprep.mubr.f32.mxu1 %v71_v26 }
  0x79   :  { %509 = vmatprep.mubr.f32.mxu0 %v73_v27 }
  0x7b   :  { %320 = vmatmul.mubr.f32.gmra.mrb[28].mxu1 %v70_v28 }
  0x7c   :  { %510 = vmatmul.mubr.f32.gmra.mrb[28].mxu0 %v72_v29  ;;  %324 = vmatprep.mubr.f32.mxu1 %v75_v30 }
  0x7d   :  { %514 = vmatprep.mubr.f32.mxu0 %v77_v31 }
  0x7f   :  { %325 = vmatmul.mubr.f32.gmra.mrb[30].mxu1 %v74_v32 }
  0x80   :  { %515 = vmatmul.mubr.f32.gmra.mrb[30].mxu0 %v76_v33  ;;  %329 = vmatprep.mubr.f32.mxu1 %v79_v34 }
  0x81   :  { %519 = vmatprep.mubr.f32.mxu0 %v81_v35 }
  0x83   :  { %330 = vmatmul.mubr.f32.gmra.mrb[32].mxu1 %v78_v36 }
  0x84   :  { %520 = vmatmul.mubr.f32.gmra.mrb[32].mxu0 %v80_v37  ;;  %334 = vmatprep.mubr.f32.mxu1 %v83_v38 }
  0x85   :  { %524 = vmatprep.mubr.f32.mxu0 %v85_v39 }
  0x87   :  { %335 = vmatmul.mubr.f32.gmra.mrb[34].mxu1 %v82_v0 }
  0x88   :  { %525 = vmatmul.mubr.f32.gmra.mrb[34].mxu0 %v84_v40  ;;  %339 = vmatprep.mubr.f32.mxu1 %v87_v41 }
  0x89   :  { %529 = vmatprep.mubr.f32.mxu0 %v89_v42 }
  0x8b   :  { %340 = vmatmul.mubr.f32.gmra.mrb[36].mxu1 %v86_v43 }
  0x8c   :  { %530 = vmatmul.mubr.f32.gmra.mrb[36].mxu0 %v88_v44  ;;  %344 = vmatprep.mubr.f32.mxu1 %v91_v45 }
  0x8d   :  { %534 = vmatprep.mubr.f32.mxu0 %v93_v46 }
  0x8f   :  { %345 = vmatmul.mubr.f32.gmra.mrb[38].mxu1 %v90_v47 }
  0x90   :  { %535 = vmatmul.mubr.f32.gmra.mrb[38].mxu0 %v92_v48  ;;  %349 = vmatprep.mubr.f32.mxu1 %v95_v49 }
  0x91   :  { %539 = vmatprep.mubr.f32.mxu0 %v97_v50 }
  0x93   :  { %350 = vmatmul.mubr.f32.gmra.mrb[40].mxu1 %v94_v51 }
  0x94   :  { %540 = vmatmul.mubr.f32.gmra.mrb[40].mxu0 %v96_v52  ;;  %354 = vmatprep.mubr.f32.mxu1 %v99_v53 }
  0x95   :  { %544 = vmatprep.mubr.f32.mxu0 %v101_v54 }
  0x97   :  { %355 = vmatmul.mubr.f32.gmra.mrb[42].mxu1 %v98_v55 }
  0x98   :  { %545 = vmatmul.mubr.f32.gmra.mrb[42].mxu0 %v100_v56  ;;  %359 = vmatprep.mubr.f32.mxu1 %v103_v57 }
  0x99   :  { %549 = vmatprep.mubr.f32.mxu0 %v105_v58 }
  0x9b   :  { %360 = vmatmul.mubr.f32.gmra.mrb[44].mxu1 %v102_v59 }
  0x9c   :  { %550 = vmatmul.mubr.f32.gmra.mrb[44].mxu0 %v104_v60  ;;  %364 = vmatprep.mubr.f32.mxu1 %v107_v61 }
  0x9d   :  { %554 = vmatprep.mubr.f32.mxu0 %v109_v62 }
  0x9f   :  { %365 = vmatmul.mubr.f32.gmra.mrb[46].mxu1 %v106_v63 }
  0xa0   :  { %555 = vmatmul.mubr.f32.gmra.mrb[46].mxu0 %v108_v1  ;;  %369 = vmatprep.mubr.f32.mxu1 %v111_v2 }
  0xa1   :  { %559 = vmatprep.mubr.f32.mxu0 %v113_v3 }
  0xa3   :  { %370 = vmatmul.mubr.f32.gmra.mrb[48].mxu1 %v110_v4 }
  0xa4   :  { %560 = vmatmul.mubr.f32.gmra.mrb[48].mxu0 %v112_v5 }
 0x116   :  { %v251_v7 = vpop.f32.mrb[0].mxu1 }
 0x117   :  { %v252_v8 = vadd.f32 %v1315_v6, %v251_v7  ;;  %v253_v9 = vpop.f32.mrb[1].mxu1  ;;  %v441_v10 = vpop.f32.mrb[0].mxu0 }
 0x118   :  { %v443_v11 = vpop.f32.mrb[1].mxu0 }
 0x119   :  { %v442_v12 = vadd.f32 %v441_v10, %v252_v8 }
 0x11a   :  { %v256_v13 = vpop.f32.mrb[2].mxu1 }
 0x11b   :  { %v565_v14 = vmax.f32 %v442_v12, 0.0  ;;  %v257_v15 = vadd.f32 %v1315_v6, %v256_v13  ;;  %v258_v16 = vpop.f32.mrb[3].mxu1  ;;  %v446_v17 = vpop.f32.mrb[2].mxu0 }
 0x11c   :  { %v448_v18 = vpop.f32.mrb[3].mxu0 }
 0x11d   :  { %590 = vst [vmem:[%s1420_s3] sm:$0xff] %v565_v14  ;;  %v447_v19 = vadd.f32 %v446_v17, %v257_v15 }
 0x11e   :  { %v261_v20 = vpop.f32.mrb[4].mxu1 }
 0x11f   :  { %v566_v21 = vmax.f32 %v447_v19, 0.0  ;;  %v262_v22 = vadd.f32 %v1315_v6, %v261_v20  ;;  %v263_v23 = vpop.f32.mrb[5].mxu1  ;;  %v451_v24 = vpop.f32.mrb[4].mxu0 }
 0x120   :  { %v453_v25 = vpop.f32.mrb[5].mxu0 }
 0x121   :  { %591 = vst [vmem:[%s1420_s3 + $0x8] sm:$0xff] %v566_v21  ;;  %v452_v26 = vadd.f32 %v451_v24, %v262_v22 }
 0x122   :  { %v266_v27 = vpop.f32.mrb[6].mxu1 }
 0x123   :  { %v567_v28 = vmax.f32 %v452_v26, 0.0  ;;  %v267_v29 = vadd.f32 %v1315_v6, %v266_v27  ;;  %v268_v30 = vpop.f32.mrb[7].mxu1  ;;  %v456_v31 = vpop.f32.mrb[6].mxu0 }
 0x124   :  { %v458_v32 = vpop.f32.mrb[7].mxu0 }
 0x125   :  { %592 = vst [vmem:[%s1420_s3 + $0x10] sm:$0xff] %v567_v28  ;;  %v457_v33 = vadd.f32 %v456_v31, %v267_v29 }
 0x126   :  { %v271_v34 = vpop.f32.mrb[8].mxu1 }
 0x127   :  { %v568_v35 = vmax.f32 %v457_v33, 0.0  ;;  %v272_v36 = vadd.f32 %v1315_v6, %v271_v34  ;;  %v273_v37 = vpop.f32.mrb[9].mxu1  ;;  %v461_v38 = vpop.f32.mrb[8].mxu0 }
 0x128   :  { %v463_v39 = vpop.f32.mrb[9].mxu0 }
 0x129   :  { %593 = vst [vmem:[%s1420_s3 + $0x18] sm:$0xff] %v568_v35  ;;  %v462_v0 = vadd.f32 %v461_v38, %v272_v36 }
 0x12a   :  { %v276_v40 = vpop.f32.mrb[10].mxu1 }
 0x12b   :  { %v569_v41 = vmax.f32 %v462_v0, 0.0  ;;  %v277_v42 = vadd.f32 %v1315_v6, %v276_v40  ;;  %v278_v43 = vpop.f32.mrb[11].mxu1  ;;  %v466_v44 = vpop.f32.mrb[10].mxu0 }
 0x12c   :  { %v468_v45 = vpop.f32.mrb[11].mxu0 }
 0x12d   :  { %594 = vst [vmem:[%s1420_s3 + $0x20] sm:$0xff] %v569_v41  ;;  %v467_v46 = vadd.f32 %v466_v44, %v277_v42 }
 0x12e   :  { %v281_v47 = vpop.f32.mrb[12].mxu1 }
 0x12f   :  { %v570_v48 = vmax.f32 %v467_v46, 0.0  ;;  %v282_v49 = vadd.f32 %v1315_v6, %v281_v47  ;;  %v283_v50 = vpop.f32.mrb[13].mxu1  ;;  %v471_v51 = vpop.f32.mrb[12].mxu0 }
 0x130   :  { %v473_v52 = vpop.f32.mrb[13].mxu0 }
 0x131   :  { %595 = vst [vmem:[%s1420_s3 + $0x28] sm:$0xff] %v570_v48  ;;  %v472_v53 = vadd.f32 %v471_v51, %v282_v49 }
 0x132   :  { %v286_v54 = vpop.f32.mrb[14].mxu1 }
 0x133   :  { %v571_v55 = vmax.f32 %v472_v53, 0.0  ;;  %v287_v56 = vadd.f32 %v1315_v6, %v286_v54  ;;  %v288_v57 = vpop.f32.mrb[15].mxu1  ;;  %v476_v58 = vpop.f32.mrb[14].mxu0 }
 0x134   :  { %v478_v59 = vpop.f32.mrb[15].mxu0 }
 0x135   :  { %596 = vst [vmem:[%s1420_s3 + $0x30] sm:$0xff] %v571_v55  ;;  %v477_v60 = vadd.f32 %v476_v58, %v287_v56 }
 0x136   :  { %v291_v61 = vpop.f32.mrb[16].mxu1 }
 0x137   :  { %v572_v62 = vmax.f32 %v477_v60, 0.0  ;;  %v292_v63 = vadd.f32 %v1315_v6, %v291_v61  ;;  %v293_v1 = vpop.f32.mrb[17].mxu1  ;;  %v481_v2 = vpop.f32.mrb[16].mxu0 }
 0x138   :  { %v483_v3 = vpop.f32.mrb[17].mxu0 }
 0x139   :  { %597 = vst [vmem:[%s1420_s3 + $0x38] sm:$0xff] %v572_v62  ;;  %v482_v4 = vadd.f32 %v481_v2, %v292_v63 }
 0x13a   :  { %v296_v5 = vpop.f32.mrb[18].mxu1 }
 0x13b   :  { %v573_v7 = vmax.f32 %v482_v4, 0.0  ;;  %v297_v8 = vadd.f32 %v1315_v6, %v296_v5  ;;  %v298_v9 = vpop.f32.mrb[19].mxu1  ;;  %v486_v10 = vpop.f32.mrb[18].mxu0 }
 0x13c   :  { %v488_v11 = vpop.f32.mrb[19].mxu0 }
 0x13d   :  { %598 = vst [vmem:[%s1420_s3 + $0x40] sm:$0xff] %v573_v7  ;;  %v487_v12 = vadd.f32 %v486_v10, %v297_v8 }
 0x13e   :  { %v301_v13 = vpop.f32.mrb[20].mxu1 }
 0x13f   :  { %v574_v14 = vmax.f32 %v487_v12, 0.0  ;;  %v302_v15 = vadd.f32 %v1315_v6, %v301_v13  ;;  %v303_v16 = vpop.f32.mrb[21].mxu1  ;;  %v491_v17 = vpop.f32.mrb[20].mxu0 }
 0x140   :  { %v493_v18 = vpop.f32.mrb[21].mxu0 }
 0x141   :  { %599 = vst [vmem:[%s1420_s3 + $0x48] sm:$0xff] %v574_v14  ;;  %v492_v19 = vadd.f32 %v491_v17, %v302_v15 }
 0x142   :  { %v306_v20 = vpop.f32.mrb[22].mxu1 }
 0x143   :  { %v575_v21 = vmax.f32 %v492_v19, 0.0  ;;  %v307_v22 = vadd.f32 %v1315_v6, %v306_v20  ;;  %v308_v23 = vpop.f32.mrb[23].mxu1  ;;  %v496_v24 = vpop.f32.mrb[22].mxu0 }
 0x144   :  { %v498_v25 = vpop.f32.mrb[23].mxu0 }
 0x145   :  { %600 = vst [vmem:[%s1420_s3 + $0x50] sm:$0xff] %v575_v21  ;;  %v497_v26 = vadd.f32 %v496_v24, %v307_v22 }
 0x146   :  { %v311_v27 = vpop.f32.mrb[24].mxu1 }
 0x147   :  { %v576_v28 = vmax.f32 %v497_v26, 0.0  ;;  %v312_v29 = vadd.f32 %v1315_v6, %v311_v27  ;;  %v313_v30 = vpop.f32.mrb[25].mxu1  ;;  %v501_v31 = vpop.f32.mrb[24].mxu0 }
 0x148   :  { %v503_v32 = vpop.f32.mrb[25].mxu0 }
 0x149   :  { %601 = vst [vmem:[%s1420_s3 + $0x58] sm:$0xff] %v576_v28  ;;  %v502_v33 = vadd.f32 %v501_v31, %v312_v29 }
 0x14a   :  { %v316_v34 = vpop.f32.mrb[26].mxu1 }
 0x14b   :  { %v577_v35 = vmax.f32 %v502_v33, 0.0  ;;  %v317_v36 = vadd.f32 %v1315_v6, %v316_v34  ;;  %v318_v37 = vpop.f32.mrb[27].mxu1  ;;  %v506_v38 = vpop.f32.mrb[26].mxu0 }
 0x14c   :  { %v508_v39 = vpop.f32.mrb[27].mxu0 }
 0x14d   :  { %602 = vst [vmem:[%s1420_s3 + $0x60] sm:$0xff] %v577_v35  ;;  %v507_v0 = vadd.f32 %v506_v38, %v317_v36 }
 0x14e   :  { %v321_v40 = vpop.f32.mrb[28].mxu1 }
 0x14f   :  { %v578_v41 = vmax.f32 %v507_v0, 0.0  ;;  %v322_v42 = vadd.f32 %v1315_v6, %v321_v40  ;;  %v323_v43 = vpop.f32.mrb[29].mxu1  ;;  %v511_v44 = vpop.f32.mrb[28].mxu0 }
 0x150   :  { %v513_v45 = vpop.f32.mrb[29].mxu0 }
 0x151   :  { %603 = vst [vmem:[%s1420_s3 + $0x68] sm:$0xff] %v578_v41  ;;  %v512_v46 = vadd.f32 %v511_v44, %v322_v42 }
 0x152   :  { %v326_v47 = vpop.f32.mrb[30].mxu1 }
 0x153   :  { %v579_v48 = vmax.f32 %v512_v46, 0.0  ;;  %v327_v49 = vadd.f32 %v1315_v6, %v326_v47  ;;  %v328_v50 = vpop.f32.mrb[31].mxu1  ;;  %v516_v51 = vpop.f32.mrb[30].mxu0 }
 0x154   :  { %v518_v52 = vpop.f32.mrb[31].mxu0 }
 0x155   :  { %604 = vst [vmem:[%s1420_s3 + $0x70] sm:$0xff] %v579_v48  ;;  %v517_v53 = vadd.f32 %v516_v51, %v327_v49 }
 0x156   :  { %v331_v54 = vpop.f32.mrb[32].mxu1 }
 0x157   :  { %v580_v55 = vmax.f32 %v517_v53, 0.0  ;;  %v332_v56 = vadd.f32 %v1315_v6, %v331_v54  ;;  %v333_v57 = vpop.f32.mrb[33].mxu1  ;;  %v521_v58 = vpop.f32.mrb[32].mxu0 }
 0x158   :  { %v523_v59 = vpop.f32.mrb[33].mxu0 }
 0x159   :  { %605 = vst [vmem:[%s1420_s3 + $0x78] sm:$0xff] %v580_v55  ;;  %v522_v60 = vadd.f32 %v521_v58, %v332_v56 }
 0x15a   :  { %v336_v61 = vpop.f32.mrb[34].mxu1 }
 0x15b   :  { %v581_v62 = vmax.f32 %v522_v60, 0.0  ;;  %v337_v63 = vadd.f32 %v1315_v6, %v336_v61  ;;  %v338_v1 = vpop.f32.mrb[35].mxu1  ;;  %v526_v2 = vpop.f32.mrb[34].mxu0 }
 0x15c   :  { %v528_v3 = vpop.f32.mrb[35].mxu0 }
 0x15d   :  { %606 = vst [vmem:[%s1420_s3 + $0x80] sm:$0xff] %v581_v62  ;;  %v527_v4 = vadd.f32 %v526_v2, %v337_v63 }
 0x15e   :  { %v341_v5 = vpop.f32.mrb[36].mxu1 }
 0x15f   :  { %v582_v7 = vmax.f32 %v527_v4, 0.0  ;;  %v342_v8 = vadd.f32 %v1315_v6, %v341_v5  ;;  %v343_v9 = vpop.f32.mrb[37].mxu1  ;;  %v531_v10 = vpop.f32.mrb[36].mxu0 }
 0x160   :  { %v533_v11 = vpop.f32.mrb[37].mxu0 }
 0x161   :  { %607 = vst [vmem:[%s1420_s3 + $0x88] sm:$0xff] %v582_v7  ;;  %v532_v12 = vadd.f32 %v531_v10, %v342_v8 }
 0x162   :  { %v346_v13 = vpop.f32.mrb[38].mxu1 }
 0x163   :  { %v583_v14 = vmax.f32 %v532_v12, 0.0  ;;  %v347_v15 = vadd.f32 %v1315_v6, %v346_v13  ;;  %v348_v16 = vpop.f32.mrb[39].mxu1  ;;  %v536_v17 = vpop.f32.mrb[38].mxu0 }
 0x164   :  { %v538_v18 = vpop.f32.mrb[39].mxu0 }
 0x165   :  { %608 = vst [vmem:[%s1420_s3 + $0x90] sm:$0xff] %v583_v14  ;;  %v537_v19 = vadd.f32 %v536_v17, %v347_v15 }
 0x166   :  { %v351_v20 = vpop.f32.mrb[40].mxu1 }
 0x167   :  { %v584_v21 = vmax.f32 %v537_v19, 0.0  ;;  %v352_v22 = vadd.f32 %v1315_v6, %v351_v20  ;;  %v353_v23 = vpop.f32.mrb[41].mxu1  ;;  %v541_v24 = vpop.f32.mrb[40].mxu0 }
 0x168   :  { %v543_v25 = vpop.f32.mrb[41].mxu0 }
 0x169   :  { %609 = vst [vmem:[%s1420_s3 + $0x98] sm:$0xff] %v584_v21  ;;  %v542_v26 = vadd.f32 %v541_v24, %v352_v22 }
 0x16a   :  { %v356_v27 = vpop.f32.mrb[42].mxu1 }
 0x16b   :  { %v585_v28 = vmax.f32 %v542_v26, 0.0  ;;  %v357_v29 = vadd.f32 %v1315_v6, %v356_v27  ;;  %v358_v30 = vpop.f32.mrb[43].mxu1  ;;  %v546_v31 = vpop.f32.mrb[42].mxu0 }
 0x16c   :  { %v548_v32 = vpop.f32.mrb[43].mxu0 }
 0x16d   :  { %610 = vst [vmem:[%s1420_s3 + $0xa0] sm:$0xff] %v585_v28  ;;  %v547_v33 = vadd.f32 %v546_v31, %v357_v29 }
 0x16e   :  { %v361_v34 = vpop.f32.mrb[44].mxu1 }
 0x16f   :  { %v586_v35 = vmax.f32 %v547_v33, 0.0  ;;  %v362_v36 = vadd.f32 %v1315_v6, %v361_v34  ;;  %v363_v37 = vpop.f32.mrb[45].mxu1  ;;  %v551_v38 = vpop.f32.mrb[44].mxu0 }
 0x170   :  { %v553_v39 = vpop.f32.mrb[45].mxu0 }
 0x171   :  { %611 = vst [vmem:[%s1420_s3 + $0xa8] sm:$0xff] %v586_v35  ;;  %v552_v0 = vadd.f32 %v551_v38, %v362_v36 }
 0x172   :  { %v366_v40 = vpop.f32.mrb[46].mxu1 }
 0x173   :  { %v587_v41 = vmax.f32 %v552_v0, 0.0  ;;  %v367_v42 = vadd.f32 %v1315_v6, %v366_v40  ;;  %v368_v43 = vpop.f32.mrb[47].mxu1  ;;  %v556_v44 = vpop.f32.mrb[46].mxu0 }
 0x174   :  { %v558_v45 = vpop.f32.mrb[47].mxu0 }
 0x175   :  { %612 = vst [vmem:[%s1420_s3 + $0xb0] sm:$0xff] %v587_v41  ;;  %v557_v46 = vadd.f32 %v556_v44, %v367_v42 }
 0x176   :  { %v371_v47 = vpop.f32.mrb[48].mxu1 }
 0x177   :  { %v588_v48 = vmax.f32 %v557_v46, 0.0  ;;  %v372_v49 = vadd.f32 %v1315_v6, %v371_v47  ;;  %v373_v50 = vpop.f32.mrb[49].mxu1  ;;  %v561_v51 = vpop.f32.mrb[48].mxu0 }
 0x178   :  { %v563_v52 = vpop.f32.mrb[49].mxu0 }
 0x179   :  { %613 = vst [vmem:[%s1420_s3 + $0xb8] sm:$0xff] %v588_v48  ;;  %v562_v53 = vadd.f32 %v561_v51, %v372_v49 }
 0x17b   :  { %v589_v54 = vmax.f32 %v562_v53, 0.0 }
 0x17d   :  { %614 = vst [vmem:[%s1420_s3 + $0xc0] sm:$0xff] %v589_v54 }

// kernel: lenet_forward.8
= control target key start
LH: loop header
LB: loop body
LE: loop exit
PB: predicated region body
PF: predicated region fallthrough
CT: control target
= control target key end

     0   :  { %s207_s0 = inlined_call_operand.vmem [shape: f32[56,128], index: 0, kind: input, shape index: {}]   ;;  %s208_s1 = inlined_call_operand.vmem [shape: f32[56,128], index: 1, kind: input, shape index: {}]   ;;  %s209_s2 = inlined_call_operand.vmem [shape: f32[56,128], index: 2, kind: input, shape index: {}]   ;;  %s210_s3 = inlined_call_operand.vmem [shape: f32[56,128], index: 3, kind: input, shape index: {}]   ;;  %s211_s4 = inlined_call_operand.vmem [shape: f32[56,128], index: 4, kind: output, shape index: {}]  }
   0x1   :  { %v17_v0 = vld [vmem:[%s207_s0] sm:$0xff]  ;;  %v18_v5 = vld [vmem:[%s207_s0 + $0x8] sm:$0xff]  ;;  %v19_v11 = vld [vmem:[%s207_s0 + $0x10] sm:$0xff] }
   0x2   :  { %v24_v1 = vld [vmem:[%s208_s1] sm:$0xff]  ;;  %v25_v6 = vld [vmem:[%s208_s1 + $0x8] sm:$0xff]  ;;  %v26_v13 = vld [vmem:[%s208_s1 + $0x10] sm:$0xff] }
   0x3   :  { %v38_v2 = vld [vmem:[%s209_s2] sm:$0xff]  ;;  %v31_v3 = vmax.f32 %v17_v0, %v24_v1  ;;  %v32_v8 = vmax.f32 %v18_v5, %v25_v6  ;;  %v39_v9 = vld [vmem:[%s209_s2 + $0x8] sm:$0xff]  ;;  %v40_v14 = vld [vmem:[%s209_s2 + $0x10] sm:$0xff]  ;;  %v33_v17 = vmax.f32 %v19_v11, %v26_v13 }
   0x4   :  { %v45_v4 = vld [vmem:[%s210_s3] sm:$0xff]  ;;  %v46_v10 = vld [vmem:[%s210_s3 + $0x8] sm:$0xff]  ;;  %v47_v15 = vld [vmem:[%s210_s3 + $0x10] sm:$0xff] }
   0x5   :  { %v52_v7 = vmax.f32 %v38_v2, %v45_v4  ;;  %v53_v12 = vmax.f32 %v39_v9, %v46_v10  ;;  %v54_v18 = vmax.f32 %v40_v14, %v47_v15  ;;  %v20_v19 = vld [vmem:[%s207_s0 + $0x18] sm:$0xff]  ;;  %v21_v25 = vld [vmem:[%s207_s0 + $0x20] sm:$0xff]  ;;  %v22_v32 = vld [vmem:[%s207_s0 + $0x28] sm:$0xff] }
   0x6   :  { %v27_v20 = vld [vmem:[%s208_s1 + $0x18] sm:$0xff]  ;;  %v28_v26 = vld [vmem:[%s208_s1 + $0x20] sm:$0xff]  ;;  %v29_v34 = vld [vmem:[%s208_s1 + $0x28] sm:$0xff] }
   0x7   :  { %v59_v16 = vmax.f32 %v31_v3, %v52_v7  ;;  %v41_v21 = vld [vmem:[%s209_s2 + $0x18] sm:$0xff]  ;;  %v60_v22 = vmax.f32 %v32_v8, %v53_v12  ;;  %v34_v23 = vmax.f32 %v20_v19, %v27_v20  ;;  %v61_v27 = vmax.f32 %v33_v17, %v54_v18  ;;  %v42_v30 = vld [vmem:[%s209_s2 + $0x20] sm:$0xff]  ;;  %v43_v35 = vld [vmem:[%s209_s2 + $0x28] sm:$0xff] }
   0x8   :  { %v48_v24 = vld [vmem:[%s210_s3 + $0x18] sm:$0xff]  ;;  %v35_v29 = vmax.f32 %v21_v25, %v28_v26  ;;  %v49_v31 = vld [vmem:[%s210_s3 + $0x20] sm:$0xff]  ;;  %v50_v36 = vld [vmem:[%s210_s3 + $0x28] sm:$0xff]  ;;  %v36_v38 = vmax.f32 %v22_v32, %v29_v34 }
   0x9   :  { %66 = vst [vmem:[%s211_s4] sm:$0xff] %v59_v16  ;;  %v55_v28 = vmax.f32 %v41_v21, %v48_v24  ;;  %67 = vst [vmem:[%s211_s4 + $0x8] sm:$0xff] %v60_v22  ;;  %v56_v33 = vmax.f32 %v42_v30, %v49_v31  ;;  %v57_v39 = vmax.f32 %v43_v35, %v50_v36  ;;  %v23_v40 = vld [vmem:[%s207_s0 + $0x30] sm:$0xff] }
   0xa   :  { %68 = vst [vmem:[%s211_s4 + $0x10] sm:$0xff] %v61_v27  ;;  %v30_v41 = vld [vmem:[%s208_s1 + $0x30] sm:$0xff] }
   0xb   :  { %v62_v37 = vmax.f32 %v34_v23, %v55_v28  ;;  %v44_v42 = vld [vmem:[%s209_s2 + $0x30] sm:$0xff]  ;;  %v63_v43 = vmax.f32 %v35_v29, %v56_v33  ;;  %v37_v44 = vmax.f32 %v23_v40, %v30_v41  ;;  %v64_v46 = vmax.f32 %v36_v38, %v57_v39 }
   0xc   :  { %v51_v45 = vld [vmem:[%s210_s3 + $0x30] sm:$0xff] }
   0xd   :  { %69 = vst [vmem:[%s211_s4 + $0x18] sm:$0xff] %v62_v37  ;;  %v58_v47 = vmax.f32 %v44_v42, %v51_v45  ;;  %70 = vst [vmem:[%s211_s4 + $0x20] sm:$0xff] %v63_v43 }
   0xe   :  { %71 = vst [vmem:[%s211_s4 + $0x28] sm:$0xff] %v64_v46 }
   0xf   :  { %v65_v48 = vmax.f32 %v37_v44, %v58_v47 }
  0x11   :  { %72 = vst [vmem:[%s211_s4 + $0x30] sm:$0xff] %v65_v48 }

// kernel: lenet_forward.9
= control target key start
LH: loop header
LB: loop body
LE: loop exit
PB: predicated region body
PF: predicated region fallthrough
CT: control target
= control target key end

     0   :  { %vm1000_vm0 = vmmov 0   ;;  %vm140_vm1 = vcmask 261120   ;;  %s1492_s1 = inlined_call_operand.vmem [shape: f32[800,128], index: 1, kind: input, shape index: {}]   ;;  %s1493_s0 = inlined_call_operand.vmem [shape: f32[8,800], index: 0, kind: input, shape index: {}]   ;;  %s1494_s3 = inlined_call_operand.vmem [shape: f32[128,128], index: 3, kind: input, shape index: {}]   ;;  %s1495_s5 = inlined_call_operand.vmem [shape: f32[128,128], index: 5, kind: input, shape index: {}]   ;;  %s1496_s2 = inlined_call_operand.vmem [shape: f32[1,128], index: 2, kind: input, shape index: {}]   ;;  %s1497_s4 = inlined_call_operand.vmem [shape: f32[1,128], index: 4, kind: input, shape index: {}]   ;;  %s1498_s6 = inlined_call_operand.vmem [shape: f32[1,128], index: 6, kind: input, shape index: {}]   ;;  %s1499_s7 = inlined_call_operand.vmem [shape: f32[8,128], index: 7, kind: output, shape index: {}]  }
   0x1   :  { %v49_v0 = vld [vmem:[%s1492_s1 + $0x80] sm:$0xff]  ;;  %v50_v1 = vld [vmem:[%s1492_s1 + $0x88] sm:$0xff]  ;;  %v51_v11 = vld [vmem:[%s1492_s1 + $0x90] sm:$0xff] }
   0x2   :  { %v33_v2 = vld [vmem:[%s1492_s1] sm:$0xff]  ;;  %v846_v3 = vpack.c.bf16 %v50_v1, %v49_v0  ;;  %v34_v4 = vld [vmem:[%s1492_s1 + $0x8] sm:$0xff]  ;;  %v52_v13 = vld [vmem:[%s1492_s1 + $0x98] sm:$0xff] }
   0x3   :  { %v81_v5 = vld [vmem:[%s1492_s1 + $0x180] sm:$0xff]  ;;  %v82_v6 = vld [vmem:[%s1492_s1 + $0x188] sm:$0xff]  ;;  %v848_v7 = vpack.c.bf16 %v34_v4, %v33_v2  ;;  %v35_v14 = vld [vmem:[%s1492_s1 + $0x10] sm:$0xff]  ;;  %v850_v16 = vpack.c.bf16 %v52_v13, %v51_v11 }
   0x4   :  { %v878_v8 = vpack.c.bf16 %v82_v6, %v81_v5  ;;  %v65_v9 = vld [vmem:[%s1492_s1 + $0x100] sm:$0xff]  ;;  %v66_v10 = vld [vmem:[%s1492_s1 + $0x108] sm:$0xff]  ;;  %847 = vmatprep.subr.bf16.mxu0 %v846_v3  ;;  %v36_v15 = vld [vmem:[%s1492_s1 + $0x18] sm:$0xff] }
   0x5   :  { %v880_v12 = vpack.c.bf16 %v66_v10, %v65_v9  ;;  %849 = vmatpush3.bf16.msra.mxu0 %v848_v7  ;;  %v852_v17 = vpack.c.bf16 %v36_v15, %v35_v14  ;;  %v83_v18 = vld [vmem:[%s1492_s1 + $0x190] sm:$0xff]  ;;  %v84_v19 = vld [vmem:[%s1492_s1 + $0x198] sm:$0xff]  ;;  %v53_v23 = vld [vmem:[%s1492_s1 + $0xa0] sm:$0xff] }
   0x6   :  { %879 = vmatprep.subr.bf16.mxu1 %v878_v8  ;;  %v67_v20 = vld [vmem:[%s1492_s1 + $0x110] sm:$0xff]  ;;  %v882_v21 = vpack.c.bf16 %v84_v19, %v83_v18  ;;  %v68_v22 = vld [vmem:[%s1492_s1 + $0x118] sm:$0xff]  ;;  %v54_v24 = vld [vmem:[%s1492_s1 + $0xa8] sm:$0xff]  ;;  %851 = vmatprep.subr.bf16.mxu0 %v850_v16 }
   0x7   :  { %881 = vmatpush3.bf16.msra.mxu1 %v880_v12  ;;  %v884_v25 = vpack.c.bf16 %v68_v22, %v67_v20  ;;  %v854_v26 = vpack.c.bf16 %v54_v24, %v53_v23  ;;  %v37_v27 = vld [vmem:[%s1492_s1 + $0x20] sm:$0xff]  ;;  %v38_v28 = vld [vmem:[%s1492_s1 + $0x28] sm:$0xff]  ;;  %v55_v35 = vld [vmem:[%s1492_s1 + $0xb0] sm:$0xff] }
   0x8   :  { %v85_v29 = vld [vmem:[%s1492_s1 + $0x1a0] sm:$0xff]  ;;  %883 = vmatprep.subr.bf16.mxu1 %v882_v21  ;;  %v86_v30 = vld [vmem:[%s1492_s1 + $0x1a8] sm:$0xff]  ;;  %v856_v33 = vpack.c.bf16 %v38_v28, %v37_v27  ;;  %v56_v36 = vld [vmem:[%s1492_s1 + $0xb8] sm:$0xff] }
   0x9   :  { %v69_v31 = vld [vmem:[%s1492_s1 + $0x120] sm:$0xff]  ;;  %v70_v32 = vld [vmem:[%s1492_s1 + $0x128] sm:$0xff]  ;;  %853 = vmatpush3.bf16.msra.mxu0 %v852_v17  ;;  %v886_v34 = vpack.c.bf16 %v86_v30, %v85_v29  ;;  %v39_v37 = vld [vmem:[%s1492_s1 + $0x30] sm:$0xff]  ;;  %v858_v39 = vpack.c.bf16 %v56_v36, %v55_v35 }
   0xa   :  { %855 = vmatprep.subr.bf16.mxu0 %v854_v26  ;;  %v888_v38 = vpack.c.bf16 %v70_v32, %v69_v31  ;;  %v40_v40 = vld [vmem:[%s1492_s1 + $0x38] sm:$0xff]  ;;  %v87_v41 = vld [vmem:[%s1492_s1 + $0x1b0] sm:$0xff]  ;;  %v57_v46 = vld [vmem:[%s1492_s1 + $0xc0] sm:$0xff] }
   0xb   :  { %885 = vmatpush3.bf16.msra.mxu1 %v884_v25  ;;  %v88_v42 = vld [vmem:[%s1492_s1 + $0x1b8] sm:$0xff]  ;;  %v71_v44 = vld [vmem:[%s1492_s1 + $0x130] sm:$0xff]  ;;  %v58_v47 = vld [vmem:[%s1492_s1 + $0xc8] sm:$0xff]  ;;  %v860_v48 = vpack.c.bf16 %v40_v40, %v39_v37 }
   0xc   :  { %887 = vmatprep.subr.bf16.mxu1 %v886_v34  ;;  %v890_v43 = vpack.c.bf16 %v88_v42, %v87_v41  ;;  %v72_v45 = vld [vmem:[%s1492_s1 + $0x138] sm:$0xff]  ;;  %v89_v49 = vld [vmem:[%s1492_s1 + $0x1c0] sm:$0xff]  ;;  %v90_v50 = vld [vmem:[%s1492_s1 + $0x1c8] sm:$0xff]  ;;  %v862_v52 = vpack.c.bf16 %v58_v47, %v57_v46 }
   0xd   :  { %857 = vmatpush3.bf16.msra.mxu0 %v856_v33  ;;  %v892_v51 = vpack.c.bf16 %v72_v45, %v71_v44  ;;  %v41_v53 = vld [vmem:[%s1492_s1 + $0x40] sm:$0xff]  ;;  %v42_v54 = vld [vmem:[%s1492_s1 + $0x48] sm:$0xff]  ;;  %v894_v56 = vpack.c.bf16 %v90_v50, %v89_v49  ;;  %v59_v58 = vld [vmem:[%s1492_s1 + $0xd0] sm:$0xff] }
   0xe   :  { %859 = vmatprep.subr.bf16.mxu0 %v858_v39  ;;  %v73_v55 = vld [vmem:[%s1492_s1 + $0x140] sm:$0xff]  ;;  %v74_v57 = vld [vmem:[%s1492_s1 + $0x148] sm:$0xff]  ;;  %v60_v59 = vld [vmem:[%s1492_s1 + $0xd8] sm:$0xff]  ;;  %v864_v62 = vpack.c.bf16 %v42_v54, %v41_v53 }
   0xf   :  { %889 = vmatpush3.bf16.msra.mxu1 %v888_v38  ;;  %v91_v60 = vld [vmem:[%s1492_s1 + $0x1d0] sm:$0xff]  ;;  %v92_v61 = vld [vmem:[%s1492_s1 + $0x1d8] sm:$0xff]  ;;  %v896_v63 = vpack.c.bf16 %v74_v57, %v73_v55  ;;  %v866_v0 = vpack.c.bf16 %v60_v59, %v59_v58  ;;  %v61_v6 = vld [vmem:[%s1492_s1 + $0xe0] sm:$0xff] }
  0x10   :  { %891 = vmatprep.subr.bf16.mxu1 %v890_v43  ;;  %v43_v1 = vld [vmem:[%s1492_s1 + $0x50] sm:$0xff]  ;;  %v44_v2 = vld [vmem:[%s1492_s1 + $0x58] sm:$0xff]  ;;  %v898_v4 = vpack.c.bf16 %v92_v61, %v91_v60  ;;  %v62_v7 = vld [vmem:[%s1492_s1 + $0xe8] sm:$0xff] }
  0x11   :  { %861 = vmatpush3.bf16.msra.mxu0 %v860_v48  ;;  %v75_v3 = vld [vmem:[%s1492_s1 + $0x150] sm:$0xff]  ;;  %v76_v5 = vld [vmem:[%s1492_s1 + $0x158] sm:$0xff]  ;;  %v93_v8 = vld [vmem:[%s1492_s1 + $0x1e0] sm:$0xff]  ;;  %v868_v10 = vpack.c.bf16 %v44_v2, %v43_v1  ;;  %v870_v14 = vpack.c.bf16 %v62_v7, %v61_v6 }
  0x12   :  { %863 = vmatprep.subr.bf16.mxu0 %v862_v52  ;;  %v94_v9 = vld [vmem:[%s1492_s1 + $0x1e8] sm:$0xff]  ;;  %v45_v11 = vld [vmem:[%s1492_s1 + $0x60] sm:$0xff]  ;;  %v900_v13 = vpack.c.bf16 %v76_v5, %v75_v3  ;;  %v63_v19 = vld [vmem:[%s1492_s1 + $0xf0] sm:$0xff] }
  0x13   :  { %893 = vmatpush3.bf16.msra.mxu1 %v892_v51  ;;  %v27_v12 = vld [vmem:[%s1493_s0 + $0x8] sm:$0xff]  ;;  %v77_v16 = vld [vmem:[%s1492_s1 + $0x160] sm:$0xff]  ;;  %v902_v18 = vpack.c.bf16 %v94_v9, %v93_v8  ;;  %v64_v20 = vld [vmem:[%s1492_s1 + $0xf8] sm:$0xff]  ;;  %v999_v51 = vmov 0.0|0.0  }
  0x14   :  { %895 = vmatprep.subr.bf16.mxu1 %v894_v56  ;;  %v46_v15 = vld [vmem:[%s1492_s1 + $0x68] sm:$0xff]  ;;  %208 = vmatprep.mubr.f32.mxu0 %v27_v12  ;;  %v29_v21 = vld [vmem:[%s1493_s0 + $0x18] sm:$0xff]  ;;  %v95_v22 = vld [vmem:[%s1492_s1 + $0x1f0] sm:$0xff]  ;;  %v874_v26 = vpack.c.bf16 %v64_v20, %v63_v19 }
  0x15   :  { %865 = vmatpush3.bf16.msra.mxu0 %v864_v62  ;;  %v78_v17 = vld [vmem:[%s1492_s1 + $0x168] sm:$0xff]  ;;  %v96_v23 = vld [vmem:[%s1492_s1 + $0x1f8] sm:$0xff]  ;;  %278 = vmatprep.mubr.f32.mxu1 %v29_v21  ;;  %v872_v24 = vpack.c.bf16 %v46_v15, %v45_v11  ;;  %v47_v27 = vld [vmem:[%s1492_s1 + $0x70] sm:$0xff] }
  0x16   :  { %867 = vmatprep.subr.bf16.mxu0 %v866_v0  ;;  %v904_v25 = vpack.c.bf16 %v78_v17, %v77_v16  ;;  %v48_v28 = vld [vmem:[%s1492_s1 + $0x78] sm:$0xff]  ;;  %v79_v29 = vld [vmem:[%s1492_s1 + $0x170] sm:$0xff]  ;;  %v906_v30 = vpack.c.bf16 %v96_v23, %v95_v22  ;;  %v113_v32 = vld [vmem:[%s1492_s1 + $0x280] sm:$0xff] }
  0x17   :  { %897 = vmatpush3.bf16.msra.mxu1 %v896_v63  ;;  %v80_v31 = vld [vmem:[%s1492_s1 + $0x178] sm:$0xff]  ;;  %v114_v33 = vld [vmem:[%s1492_s1 + $0x288] sm:$0xff]  ;;  %v876_v34 = vpack.c.bf16 %v48_v28, %v47_v27  ;;  %v97_v37 = vld [vmem:[%s1492_s1 + $0x200] sm:$0xff]  ;;  %v1001_v63 = vmov 0.0  }
  0x18   :  { %899 = vmatprep.subr.bf16.mxu1 %v898_v4  ;;  %v908_v35 = vpack.c.bf16 %v80_v31, %v79_v29  ;;  %v910_v36 = vpack.c.bf16 %v114_v33, %v113_v32  ;;  %v98_v38 = vld [vmem:[%s1492_s1 + $0x208] sm:$0xff]  ;;  %v115_v39 = vld [vmem:[%s1492_s1 + $0x290] sm:$0xff]  ;;  %v116_v40 = vld [vmem:[%s1492_s1 + $0x298] sm:$0xff] }
  0x19   :  { %869 = vmatpush3.bf16.msra.mxu0 %v868_v10  ;;  %v26_v41 = vld [vmem:[%s1493_s0] sm:$0xff]  ;;  %v912_v42 = vpack.c.bf16 %v98_v38, %v97_v37  ;;  %v28_v43 = vld [vmem:[%s1493_s0 + $0x10] sm:$0xff]  ;;  %v914_v45 = vpack.c.bf16 %v116_v40, %v115_v39  ;;  %v100_v46 = vld [vmem:[%s1492_s1 + $0x218] sm:$0xff] }
  0x1a   :  { %871 = vmatprep.subr.bf16.mxu0 %v870_v14  ;;  %v99_v44 = vld [vmem:[%s1492_s1 + $0x210] sm:$0xff]  ;;  %v129_v47 = vld [vmem:[%s1492_s1 + $0x300] sm:$0xff]  ;;  %v130_v48 = vld [vmem:[%s1492_s1 + $0x308] sm:$0xff] }
  0x1b   :  { %901 = vmatpush3.bf16.msra.mxu1 %v900_v13  ;;  %v117_v49 = vld [vmem:[%s1492_s1 + $0x2a0] sm:$0xff]  ;;  %v118_v50 = vld [vmem:[%s1492_s1 + $0x2a8] sm:$0xff]  ;;  %v943_v52 = vpack.c.bf16 %v130_v48, %v129_v47  ;;  %v131_v53 = vld [vmem:[%s1492_s1 + $0x310] sm:$0xff]  ;;  %v916_v56 = vpack.c.bf16 %v100_v46, %v99_v44 }
  0x1c   :  { %903 = vmatprep.subr.bf16.mxu1 %v902_v18  ;;  %v31_v54 = vld [vmem:[%s1493_s0 + $0x28] sm:$0xff]  ;;  %v132_v55 = vld [vmem:[%s1492_s1 + $0x318] sm:$0xff]  ;;  %v918_v57 = vpack.c.bf16 %v118_v50, %v117_v49  ;;  %v101_v58 = vld [vmem:[%s1492_s1 + $0x220] sm:$0xff] }
  0x1d   :  { %873 = vmatpush3.bf16.msra.mxu0 %v872_v24  ;;  %v102_v59 = vld [vmem:[%s1492_s1 + $0x228] sm:$0xff]  ;;  %v946_v60 = vpack.c.bf16 %v132_v55, %v131_v53  ;;  %v119_v61 = vld [vmem:[%s1492_s1 + $0x2b0] sm:$0xff]  ;;  %v120_v62 = vld [vmem:[%s1492_s1 + $0x2b8] sm:$0xff] }
  0x1e   :  { %875 = vmatprep.subr.bf16.mxu0 %v874_v26  ;;  %v920_v0 = vpack.c.bf16 %v102_v59, %v101_v58  ;;  %v922_v1 = vpack.c.bf16 %v120_v62, %v119_v61  ;;  %v103_v2 = vld [vmem:[%s1492_s1 + $0x230] sm:$0xff]  ;;  %v104_v3 = vld [vmem:[%s1492_s1 + $0x238] sm:$0xff]  ;;  %v121_v5 = vld [vmem:[%s1492_s1 + $0x2c0] sm:$0xff] }
  0x1f   :  { %905 = vmatpush3.bf16.msra.mxu1 %v904_v25  ;;  %v32_v4 = vld [vmem:[%s1493_s0 + $0x30] sm:$0xff]  ;;  %v122_v6 = vld [vmem:[%s1492_s1 + $0x2c8] sm:$0xff]  ;;  %v924_v7 = vpack.c.bf16 %v104_v3, %v103_v2  ;;  %v105_v9 = vld [vmem:[%s1492_s1 + $0x240] sm:$0xff] }
  0x20   :  { %907 = vmatprep.subr.bf16.mxu1 %v906_v30  ;;  %v926_v8 = vpack.c.bf16 %v122_v6, %v121_v5  ;;  %v106_v10 = vld [vmem:[%s1492_s1 + $0x248] sm:$0xff]  ;;  %v123_v11 = vld [vmem:[%s1492_s1 + $0x2d0] sm:$0xff]  ;;  %v124_v12 = vld [vmem:[%s1492_s1 + $0x2d8] sm:$0xff] }
  0x21   :  { %877 = vmatpush3.bf16.msra.mxu0 %v876_v34  ;;  %v928_v13 = vpack.c.bf16 %v106_v10, %v105_v9  ;;  %v930_v14 = vpack.c.bf16 %v124_v12, %v123_v11  ;;  %v107_v15 = vld [vmem:[%s1492_s1 + $0x250] sm:$0xff]  ;;  %v108_v16 = vld [vmem:[%s1492_s1 + $0x258] sm:$0xff]  ;;  %v125_v17 = vld [vmem:[%s1492_s1 + $0x2e0] sm:$0xff] }
  0x22   :  { %911 = vmatprep.subr.bf16.mxu0 %v910_v36  ;;  %v126_v18 = vld [vmem:[%s1492_s1 + $0x2e8] sm:$0xff]  ;;  %v932_v19 = vpack.c.bf16 %v108_v16, %v107_v15  ;;  %v109_v21 = vld [vmem:[%s1492_s1 + $0x260] sm:$0xff]  ;;  %v127_v23 = vld [vmem:[%s1492_s1 + $0x2f0] sm:$0xff] }
  0x23   :  { %909 = vmatpush3.bf16.msra.mxu1 %v908_v35  ;;  %v934_v20 = vpack.c.bf16 %v126_v18, %v125_v17  ;;  %v110_v22 = vld [vmem:[%s1492_s1 + $0x268] sm:$0xff]  ;;  %v128_v24 = vld [vmem:[%s1492_s1 + $0x2f8] sm:$0xff]  ;;  %v111_v27 = vld [vmem:[%s1492_s1 + $0x270] sm:$0xff] }
  0x24   :  { %942 = vmatprep.subr.bf16.mxu1 %v999_v51  ;;  %209 = vmatmul.mubr.f32.vlgmr.msra.gmra.mrb[0].mxu0 %v26_v41  ;;  %v936_v25 = vpack.c.bf16 %v110_v22, %v109_v21  ;;  %v938_v26 = vpack.c.bf16 %v128_v24, %v127_v23  ;;  %v112_v28 = vld [vmem:[%s1492_s1 + $0x278] sm:$0xff]  ;;  %v30_v30 = vld [vmem:[%s1493_s0 + $0x20] sm:$0xff]  ;;  %v426_v32 = vld [vmem:[%s1494_s3 + $0x8] sm:$0xff] }
  0x25   :  { %913 = vmatpush3.bf16.msra.mxu0 %v912_v42  ;;  %348 = vmatprep.mubr.f32.mxu0 %v31_v54  ;;  %v940_v29 = vpack.c.bf16 %v112_v28, %v111_v27  ;;  %v425_v31 = vld [vmem:[%s1494_s3] sm:$0xff]  ;;  %v427_v33 = vld [vmem:[%s1494_s3 + $0x10] sm:$0xff]  ;;  %v428_v35 = vld [vmem:[%s1494_s3 + $0x18] sm:$0xff] }
  0x26   :  { %279 = vmatmul.mubr.f32.vlgmr.msra.gmra.mrb[0].mxu1 %v28_v43  ;;  %915 = vmatprep.subr.bf16.mxu0 %v914_v45  ;;  %v949_v34 = vpack.c.bf16 %v426_v32, %v425_v31  ;;  %v952_v36 = vpack.c.bf16 %v428_v35, %v427_v33  ;;  %v429_v37 = vld [vmem:[%s1494_s3 + $0x20] sm:$0xff]  ;;  %v430_v38 = vld [vmem:[%s1494_s3 + $0x28] sm:$0xff]  ;;  %v431_v40 = vld [vmem:[%s1494_s3 + $0x30] sm:$0xff] }
  0x27   :  { %944 = vmatpush3.bf16.msra.mxu1 %v943_v52  ;;  %773 = vmatprep.mubr.msk.f32.mxu1 %vm1000_vm0, %v1001_v63  ;;  %v955_v39 = vpack.c.bf16 %v430_v38, %v429_v37  ;;  %v432_v41 = vld [vmem:[%s1494_s3 + $0x38] sm:$0xff]  ;;  %v433_v43 = vld [vmem:[%s1494_s3 + $0x40] sm:$0xff]  ;;  %v434_v44 = vld [vmem:[%s1494_s3 + $0x48] sm:$0xff] }
  0x28   :  { %945 = vmatprep.subr.bf16.mxu1 %v999_v51  ;;  %v958_v42 = vpack.c.bf16 %v432_v41, %v431_v40  ;;  %v961_v45 = vpack.c.bf16 %v434_v44, %v433_v43  ;;  %v435_v46 = vld [vmem:[%s1494_s3 + $0x50] sm:$0xff]  ;;  %v436_v47 = vld [vmem:[%s1494_s3 + $0x58] sm:$0xff]  ;;  %v437_v49 = vld [vmem:[%s1494_s3 + $0x60] sm:$0xff] }
  0x29   :  { %917 = vmatpush3.bf16.msra.mxu0 %v916_v56  ;;  %v964_v48 = vpack.c.bf16 %v436_v47, %v435_v46  ;;  %v438_v50 = vld [vmem:[%s1494_s3 + $0x68] sm:$0xff]  ;;  %v439_v53 = vld [vmem:[%s1494_s3 + $0x70] sm:$0xff]  ;;  %v440_v54 = vld [vmem:[%s1494_s3 + $0x78] sm:$0xff] }
  0x2a   :  { %919 = vmatprep.subr.bf16.mxu0 %v918_v57  ;;  %v967_v52 = vpack.c.bf16 %v438_v50, %v437_v49  ;;  %v970_v55 = vpack.c.bf16 %v440_v54, %v439_v53  ;;  %v519_v56 = vld [vmem:[%s1495_s5] sm:$0xff]  ;;  %v520_v57 = vld [vmem:[%s1495_s5 + $0x8] sm:$0xff]  ;;  %v521_v58 = vld [vmem:[%s1495_s5 + $0x10] sm:$0xff] }
  0x2b   :  { %947 = vmatpush3.bf16.msra.mxu1 %v946_v60  ;;  %v973_v59 = vpack.c.bf16 %v520_v57, %v519_v56  ;;  %v522_v60 = vld [vmem:[%s1495_s5 + $0x18] sm:$0xff]  ;;  %v523_v62 = vld [vmem:[%s1495_s5 + $0x20] sm:$0xff]  ;;  %v528_v5 = vld [vmem:[%s1495_s5 + $0x48] sm:$0xff] }
  0x2c   :  { %948 = vmatprep.subr.bf16.mxu1 %v999_v51  ;;  %v976_v61 = vpack.c.bf16 %v522_v60, %v521_v58  ;;  %v526_v2 = vld [vmem:[%s1495_s5 + $0x38] sm:$0xff]  ;;  %v531_v10 = vld [vmem:[%s1495_s5 + $0x60] sm:$0xff]  ;;  %v532_v11 = vld [vmem:[%s1495_s5 + $0x68] sm:$0xff] }
  0x2d   :  { %921 = vmatpush3.bf16.msra.mxu0 %v920_v0  ;;  %v991_v12 = vpack.c.bf16 %v532_v11, %v531_v10  ;;  %v619_v32 = vld [vmem:[%s1497_s4] ss:$0 sm:$0xff] }
  0x2e   :  { %774 = vmatmul.mubr.msk.f32.vlgmr.msra.gmra.mrb[2].mxu1 %vm140_vm1, %v32_v4  ;;  %923 = vmatprep.subr.bf16.mxu0 %v922_v1  ;;  %v525_v1 = vld [vmem:[%s1495_s5 + $0x30] sm:$0xff]  ;;  %v527_v4 = vld [vmem:[%s1495_s5 + $0x40] sm:$0xff] }
  0x2f   :  { %808 = vmatprep.mubr.msk.f32.mxu1 %vm1000_vm0, %v1001_v63  ;;  %950 = vmatpush3.bf16.msra.mxu1 %v949_v34  ;;  %v982_v3 = vpack.c.bf16 %v526_v2, %v525_v1  ;;  %v985_v6 = vpack.c.bf16 %v528_v5, %v527_v4  ;;  %v620_v37 = vld [vmem:[%s1498_s6] ss:$0 sm:$0xff] }
  0x30   :  { %951 = vmatprep.subr.bf16.mxu1 %v999_v51 }
  0x31   :  { %925 = vmatpush3.bf16.msra.mxu0 %v924_v7  ;;  %v529_v7 = vld [vmem:[%s1495_s5 + $0x50] sm:$0xff] }
  0x32   :  { %927 = vmatprep.subr.bf16.mxu0 %v926_v8  ;;  %v530_v8 = vld [vmem:[%s1495_s5 + $0x58] sm:$0xff] }
  0x33   :  { %953 = vmatpush3.bf16.msra.mxu1 %v952_v36  ;;  %v988_v9 = vpack.c.bf16 %v530_v8, %v529_v7 }
  0x34   :  { %954 = vmatprep.subr.bf16.mxu1 %v999_v51 }
  0x35   :  { %929 = vmatpush3.bf16.msra.mxu0 %v928_v13 }
  0x36   :  { %931 = vmatprep.subr.bf16.mxu0 %v930_v14  ;;  %v617_v14 = vld [vmem:[%s1496_s2] ss:$0 sm:$0xff] }
  0x37   :  { %956 = vmatpush3.bf16.msra.mxu1 %v955_v39 }
  0x38   :  { %957 = vmatprep.subr.bf16.mxu1 %v999_v51 }
  0x39   :  { %933 = vmatpush3.bf16.msra.mxu0 %v932_v19 }
  0x3a   :  { %935 = vmatprep.subr.bf16.mxu0 %v934_v20 }
  0x3b   :  { %959 = vmatpush3.bf16.msra.mxu1 %v958_v42 }
  0x3c   :  { %960 = vmatprep.subr.bf16.mxu1 %v999_v51 }
  0x3d   :  { %937 = vmatpush3.bf16.msra.mxu0 %v936_v25 }
  0x3e   :  { %939 = vmatprep.subr.bf16.mxu0 %v938_v26 }
  0x3f   :  { %962 = vmatpush3.bf16.msra.mxu1 %v961_v45 }
  0x40   :  { %963 = vmatprep.subr.bf16.mxu1 %v999_v51 }
  0x41   :  { %941 = vmatpush3.bf16.msra.mxu0 %v940_v29  ;;  %v533_v29 = vld [vmem:[%s1495_s5 + $0x70] sm:$0xff] }
  0x42   :  { %972 = vmatprep.subr.bf16.mxu0 %v999_v51 }
  0x43   :  { %965 = vmatpush3.bf16.msra.mxu1 %v964_v48 }
  0x44   :  { %349 = vmatmul.mubr.f32.vlgmr.msra.gmra.mrb[2].mxu0 %v30_v30  ;;  %966 = vmatprep.subr.bf16.mxu1 %v999_v51  ;;  %v534_v30 = vld [vmem:[%s1495_s5 + $0x78] sm:$0xff] }
  0x45   :  { %843 = vmatprep.mubr.msk.f32.mxu0 %vm1000_vm0, %v1001_v63  ;;  %974 = vmatpush3.bf16.msra.mxu0 %v973_v59  ;;  %v524_v63 = vld [vmem:[%s1495_s5 + $0x28] sm:$0xff]  ;;  %v994_v31 = vpack.c.bf16 %v534_v30, %v533_v29 }
  0x46   :  { %975 = vmatprep.subr.bf16.mxu0 %v999_v51  ;;  %v979_v0 = vpack.c.bf16 %v524_v63, %v523_v62 }
  0x47   :  { %968 = vmatpush3.bf16.msra.mxu1 %v967_v52 }
  0x48   :  { %969 = vmatprep.subr.bf16.mxu1 %v999_v51 }
  0x49   :  { %977 = vmatpush3.bf16.msra.mxu0 %v976_v61 }
  0x4a   :  { %978 = vmatprep.subr.bf16.mxu0 %v999_v51 }
  0x4b   :  { %971 = vmatpush3.bf16.msra.mxu1 %v970_v55 }
  0x4d   :  { %980 = vmatpush3.bf16.msra.mxu0 %v979_v0 }
  0x4e   :  { %981 = vmatprep.subr.bf16.mxu0 %v999_v51 }
  0x51   :  { %983 = vmatpush3.bf16.msra.mxu0 %v982_v3 }
  0x52   :  { %984 = vmatprep.subr.bf16.mxu0 %v999_v51 }
  0x55   :  { %986 = vmatpush3.bf16.msra.mxu0 %v985_v6 }
  0x56   :  { %987 = vmatprep.subr.bf16.mxu0 %v999_v51 }
  0x59   :  { %989 = vmatpush3.bf16.msra.mxu0 %v988_v9 }
  0x5a   :  { %990 = vmatprep.subr.bf16.mxu0 %v999_v51 }
  0x5d   :  { %992 = vmatpush3.bf16.msra.mxu0 %v991_v12 }
  0x5e   :  { %993 = vmatprep.subr.bf16.mxu0 %v999_v51 }
  0x61   :  { %995 = vmatpush3.bf16.msra.mxu0 %v994_v31 }
  0xf7   :  { %v653_v13 = vpop.f32.mrb[0].mxu0 }
  0xf8   :  { %v654_v15 = vpop.f32.mrb[1].mxu0 }
  0xf9   :  { %v688_v16 = vpop.f32.mrb[0].mxu1  ;;  %v655_v17 = vadd.f32 %v654_v15, %v653_v13 }
  0xfa   :  { %v689_v18 = vpop.f32.mrb[1].mxu1 }
  0xfb   :  { %v690_v19 = vadd.f32 %v689_v18, %v688_v16  ;;  %v211_v20 = vadd.f32 %v655_v17, %v617_v14 }
  0xfd   :  { %v281_v21 = vadd.f32 %v690_v19, %v211_v20 }
 0x101   :  { %v420_v22 = vpop.f32.mrb[2].mxu1 }
 0x102   :  { %v775_v23 = vpop.f32.mrb[3].mxu1 }
 0x117   :  { %v723_v24 = vpop.f32.mrb[2].mxu0 }
 0x118   :  { %v724_v25 = vpop.f32.mrb[3].mxu0 }
 0x119   :  { %v725_v26 = vadd.f32 %v724_v25, %v723_v24 }
 0x11b   :  { %v351_v27 = vadd.f32 %v725_v26, %v281_v21 }
 0x11d   :  { %v421_v28 = vadd.f32 %v420_v22, %v351_v27 }
 0x11f   :  { %v424_v51 = vmax.f32 %v421_v28, 0.0 }
 0x121   :  { %809 = vmatmul.mubr.f32.vlgmr.msra.gmra.mrb[4].mxu1 %v424_v51 }
 0x1f4   :  { %v514_v33 = vpop.f32.mrb[4].mxu1 }
 0x1f5   :  { %v515_v34 = vadd.f32 %v619_v32, %v514_v33  ;;  %v810_v35 = vpop.f32.mrb[5].mxu1 }
 0x1f7   :  { %v518_v36 = vmax.f32 %v515_v34, 0.0 }
 0x1f9   :  { %844 = vmatmul.mubr.f32.vlgmr.msra.gmra.mrb[4].mxu0 %v518_v36 }
 0x2cc   :  { %v608_v38 = vpop.f32.mrb[4].mxu0 }
 0x2cd   :  { %v609_v39 = vadd.f32 %v620_v37, %v608_v38  ;;  %v845_v40 = vpop.f32.mrb[5].mxu0 }
 0x2cf   :  { %612 = vst [vmem:[%s1499_s7] sm:$0xff] %v609_v39 }

</bundles_post_ra>
